<compile_context>
chip_gen: v7x
topology: tpu7x:2x2x1
jax: 0.10.0
libtpu: 0.0.40
codegen_flags: <defaults>
</compile_context>

<pallas_src>
import functools

import jax
import jax.numpy as jnp
from jax.experimental import pallas as pl
from jax.experimental.pallas import tpu as pltpu

CONV1_K = 5
CONV2_K = 3
CONV1_C = 64
CONV2_C = 128
HIDDEN = 100
HIDDEN_PAD = 128      # LSTM hidden padded to full lane width (extra lanes provably stay 0)
NCLASS_PAD = 128      # logits written lane-dense; real classes sliced in the wrapper
_HALO = 8             # tile-aligned halo offset for the conv2 scratch (f32 sublane tile = 8)


def _bn_relu_train(y, gamma, beta, eps=1e-5):
    """BatchNorm1d (training mode, biased batch stats over (B, L)) + ReLU.

    Two-pass mean / centred variance: everything is VMEM resident, so the extra pass is a
    cheap VPU sweep and avoids E[x^2]-E[x]^2 cancellation.
    """
    n = y.shape[0] * y.shape[1]
    mean = jnp.sum(y, axis=(0, 1), keepdims=True) * (1.0 / n)
    d = y - mean
    var = jnp.sum(d * d, axis=(0, 1), keepdims=True) * (1.0 / n)
    return jnp.maximum(d * jax.lax.rsqrt(var + eps) * gamma + beta, 0.0)


def _maxpool2(y):
    """MaxPool1d(kernel_size=2, stride=2) along axis 1 of (B, L, C)."""
    B, L, C = y.shape
    y = y.reshape(B, L // 2, 2, C)
    return jnp.maximum(y[:, :, 0, :], y[:, :, 1, :])


def fused_cnn_lstm_kernel(
    xp_ref,                                  # (B, T + K1-1, F) f32, conv1 'same'-padded input
    w1_ref, b1_ref, g1_ref, be1_ref,         # conv1 (K1, F, 64) bf16; bias/bn (1,1,64) f32
    w2_ref, b2_ref, g2_ref, be2_ref,         # conv2 (K2, 64, 128) bf16; bias/bn (1,1,128) f32
    wih_ref, whh_ref, bl_ref,                # LSTM fused gates: (128,4Hp) bf16, (Hp,4Hp) bf16, (1,4Hp) f32
    fcw_ref, fcb_ref,                        # Linear (Hp, NCLASS_PAD) bf16, (1, NCLASS_PAD) f32
    o_ref,                                   # out: (B, NCLASS_PAD) f32, lane-dense
    h1p_ref,                                 # VMEM scratch: (B, T//2 + 2*_HALO, 64) f32, conv2 halo input
    xw_ref,                                  # VMEM scratch: (B, T//4, 4*Hp) f32, hoisted LSTM input proj
):
    f32, bf16 = jnp.float32, jnp.bfloat16

    B, Tp, F = xp_ref.shape
    T = Tp - (CONV1_K - 1)
    C1 = w1_ref.shape[2]

    # ---- stage 1: conv1 ('same', K=5): 5 MXU taps on the padded input + BN + ReLU + pool
    acc1 = jnp.zeros((B * T, C1), f32)
    for k in range(CONV1_K):                  # static: 5 shifted loads + 5 matmuls
        xk = xp_ref[:, k:k + T, :].reshape(B * T, F).astype(bf16)
        acc1 = acc1 + jnp.dot(xk, w1_ref[k], preferred_element_type=f32)
    y1 = acc1.reshape(B, T, C1) + b1_ref[...]
    h1 = _maxpool2(_bn_relu_train(y1, g1_ref[...], be1_ref[...]))    # (B, L1, 64) f32
    L1 = T // 2

    # ---- stage 2: conv2 ('same', K=3): VMEM halo scratch (never leaves VMEM) + 3 MXU taps
    # Only the halo rows are zeroed (no full-scratch zero pass); the big h1 store lands at a
    # tile-aligned sublane offset (_HALO = 8).  Scratch kept f32 so the +/-1 shifted tap
    # loads stay simple sublane-shifted loads (bf16 packing would make odd-offset reads a
    # packed relayout); taps are cast to bf16 at load time for the MXU.
    h1p_ref[:, 0:_HALO, :] = jnp.zeros((B, _HALO, C1), f32)
    h1p_ref[:, _HALO + L1:2 * _HALO + L1, :] = jnp.zeros((B, _HALO, C1), f32)
    h1p_ref[:, _HALO:_HALO + L1, :] = h1                              # aligned store

    C2 = w2_ref.shape[2]
    acc2 = jnp.zeros((B * L1, C2), f32)
    for k in range(CONV2_K):                  # static: taps at offsets _HALO-1, _HALO, _HALO+1
        xk = h1p_ref[:, _HALO - 1 + k:_HALO - 1 + k + L1, :].reshape(B * L1, C1).astype(bf16)
        acc2 = acc2 + jnp.dot(xk, w2_ref[k], preferred_element_type=f32)
    y2 = acc2.reshape(B, L1, C2) + b2_ref[...]
    h2 = _maxpool2(_bn_relu_train(y2, g2_ref[...], be2_ref[...]))    # (B, T4, 128) f32
    T4 = L1 // 2

    # ---- stage 3: LSTM (fused i,f,g,o gates; hidden zero-padded 100 -> 128) + Linear ----
    G4 = wih_ref.shape[1]                     # 4 * Hp
    Hp = G4 // 4
    # Hoist the input projection out of the recurrence (one big matmul) and park it in a
    # VMEM scratch, so the (B, T4, 4Hp) block is never live in vregs across the serial loop.
    xw_ref[...] = (jnp.dot(h2.reshape(B * T4, C2).astype(bf16), wih_ref[...],
                           preferred_element_type=f32) + bl_ref[...]).reshape(B, T4, G4)

    whh = whh_ref[...]                        # (Hp, 4Hp) bf16, reused every step

    def lstm_step(t, carry):
        h_b, c = carry                                        # h carried in bf16 (matmul input)
        xt = xw_ref[:, pl.ds(t, 1), :][:, 0, :]               # (B, 4Hp) f32, cheap VMEM read
        gates = xt + jnp.dot(h_b, whh, preferred_element_type=f32)
        i = jax.nn.sigmoid(gates[:, 0 * Hp:1 * Hp])
        f = jax.nn.sigmoid(gates[:, 1 * Hp:2 * Hp])
        g = jnp.tanh(gates[:, 2 * Hp:3 * Hp])
        o = jax.nn.sigmoid(gates[:, 3 * Hp:4 * Hp])
        c = f * c + i * g
        h_b = (o * jnp.tanh(c)).astype(bf16)                  # cast once, off the matmul path
        return h_b, c

    h_b, _ = jax.lax.fori_loop(
        0, T4, lstm_step,
        (jnp.zeros((B, Hp), bf16), jnp.zeros((B, Hp), f32)),
        unroll=min(8, T4))

    # fc(h_n) -> lane-dense (B, NCLASS_PAD) slab (sliced to num_classes in the wrapper)
    o_ref[...] = jnp.dot(h_b, fcw_ref[...], preferred_element_type=f32) + fcb_ref[...]


@functools.partial(jax.jit, static_argnames=("num_classes",))
def cnn_lstm_forward(x, params, *, num_classes=2):
    # x: (B, T, input_features)  -- PyTorch input layout before permute(0, 2, 1)
    B, T, F = x.shape
    assert T % 4 == 0, "two MaxPool1d(2) stages require T % 4 == 0"
    L1, T4, G4 = T // 2, T // 4, 4 * HIDDEN_PAD

    # conv1 'same' padding only (cheap); the 5 im2col taps are formed in-kernel, so the only
    # large HBM input is ~x itself (previous version wrote/read a 5x im2col blow-up).
    pad1 = (CONV1_K - 1) // 2
    xp = jnp.pad(x, ((0, 0), (pad1, pad1), (0, 0)))

    # Explicit scoped-VMEM budget: everything (input, params, scratch, traced intermediates)
    # is VMEM resident.  Estimate the footprint, add 2x headroom + 2 MiB, clamp to v7x's
    # 64 MiB physical VMEM per TensorCore.
    param_bytes = sum(int(v.size) * v.dtype.itemsize for v in params.values())
    act_bytes = (
        xp.size * 4 + B * NCLASS_PAD * 4
        + B * (L1 + 2 * _HALO) * CONV1_C * 4            # h1p scratch (f32)
        + B * T4 * G4 * 4                               # xw scratch (f32)
        + B * T * CONV1_C * 4 * 2                       # y1 / BN temporaries
        + B * L1 * (CONV1_C * 6 + CONV2_C * 8)          # h1 (+bf16 taps), y2 / BN temporaries
        + B * T4 * (CONV2_C * 6 + G4 * 4)               # h2 (+bf16 copy), xw value
    )
    vmem_limit = int(min(max(2 * (param_bytes + act_bytes) + (2 << 20), 8 << 20), 64 << 20))

    vmem = pl.BlockSpec(memory_space=pltpu.MemorySpace.VMEM)
    out_pad = pl.pallas_call(
        fused_cnn_lstm_kernel,
        out_shape=jax.ShapeDtypeStruct((B, NCLASS_PAD), jnp.float32),
        in_specs=[vmem] * 14,
        out_specs=vmem,
        scratch_shapes=[
            pltpu.VMEM((B, L1 + 2 * _HALO, CONV1_C), jnp.float32),
            pltpu.VMEM((B, T4, G4), jnp.float32),
        ],
        compiler_params=pltpu.CompilerParams(vmem_limit_bytes=vmem_limit),
    )(
        xp,
        params["conv1_w"], params["conv1_b"], params["bn1_g"], params["bn1_b"],
        params["conv2_w"], params["conv2_b"], params["bn2_g"], params["bn2_b"],
        params["lstm_wih"], params["lstm_whh"], params["lstm_b"],
        params["fc_w"], params["fc_b"],
    )
    return out_pad[:, :num_classes]


def init_params(key, input_features, num_classes=2, hidden=HIDDEN):
    """Parameters matching the PyTorch module, pre-arranged (and pre-cast) for the kernel."""
    ks = jax.random.split(key, 9)
    H, Hp = hidden, HIDDEN_PAD
    bf16 = jnp.bfloat16
    p = {}

    # Conv1d weights generated as (K, Cin, Cout) (= transpose of PyTorch (Cout, Cin, K)),
    # stored bf16 once so the forward pass launches no per-call convert ops.
    p["conv1_w"] = (0.1 * jax.random.normal(
        ks[0], (CONV1_K, input_features, CONV1_C), jnp.float32)).astype(bf16)
    p["conv1_b"] = (0.1 * jax.random.normal(ks[1], (CONV1_C,), jnp.float32)
                    ).reshape(1, 1, CONV1_C)
    p["bn1_g"] = jnp.ones((1, 1, CONV1_C), jnp.float32)     # PyTorch BatchNorm init: gamma=1
    p["bn1_b"] = jnp.zeros((1, 1, CONV1_C), jnp.float32)    # beta=0

    p["conv2_w"] = (0.1 * jax.random.normal(
        ks[2], (CONV2_K, CONV1_C, CONV2_C), jnp.float32)).astype(bf16)
    p["conv2_b"] = (0.1 * jax.random.normal(ks[3], (CONV2_C,), jnp.float32)
                    ).reshape(1, 1, CONV2_C)
    p["bn2_g"] = jnp.ones((1, 1, CONV2_C), jnp.float32)
    p["bn2_b"] = jnp.zeros((1, 1, CONV2_C), jnp.float32)

    # LSTM: per-gate (i, f, g, o) weights, zero-padded H -> Hp and fused along columns.
    # Padded lanes stay 0 through the recurrence (g = tanh(0) = 0 and c starts at 0).
    wih_g = 0.1 * jax.random.normal(ks[4], (4, CONV2_C, H), jnp.float32)
    whh_g = 0.1 * jax.random.normal(ks[5], (4, H, H), jnp.float32)
    b_g = 0.1 * jax.random.normal(ks[6], (4, H), jnp.float32)         # = b_ih + b_hh
    wih_p = jnp.pad(wih_g, ((0, 0), (0, 0), (0, Hp - H)))             # (4, Cin, Hp)
    whh_p = jnp.pad(whh_g, ((0, 0), (0, Hp - H), (0, Hp - H)))        # (4, Hp, Hp)
    b_p = jnp.pad(b_g, ((0, 0), (0, Hp - H)))                         # (4, Hp)
    p["lstm_wih"] = jnp.transpose(wih_p, (1, 0, 2)).reshape(CONV2_C, 4 * Hp).astype(bf16)
    p["lstm_whh"] = jnp.transpose(whh_p, (1, 0, 2)).reshape(Hp, 4 * Hp).astype(bf16)
    p["lstm_b"] = b_p.reshape(1, 4 * Hp)

    # Linear(100, num_classes), zero-padded to (Hp, NCLASS_PAD) for a lane-dense output slab.
    fc_w = 0.1 * jax.random.normal(ks[7], (H, num_classes), jnp.float32)
    fc_b = 0.1 * jax.random.normal(ks[8], (num_classes,), jnp.float32)
    p["fc_w"] = jnp.pad(fc_w, ((0, Hp - H), (0, NCLASS_PAD - num_classes))).astype(bf16)
    p["fc_b"] = jnp.pad(fc_b, ((0, NCLASS_PAD - num_classes),)).reshape(1, NCLASS_PAD)
    return p


if __name__ == "__main__":
    key = jax.random.PRNGKey(0)
    k_x, k_p = jax.random.split(key)

    B, T, F = 2, 16, 8          # batch, seq_len, input_features
    num_classes = 2

    x = jax.random.normal(k_x, (B, T, F), jnp.float32)
    params = init_params(k_p, input_features=F, num_classes=num_classes)

    logits = cnn_lstm_forward(x, params, num_classes=num_classes)
    jax.block_until_ready(logits)

    assert logits.shape == (B, num_classes)
    assert logits.dtype == jnp.float32
    print("KERNEL_OK")
</pallas_src>

<mosaic_0001>
module attributes {stable_mosaic.version = 11 : i64} {
  func.func @fused_cnn_lstm_kernel(%arg0: memref<2x20x8xf32, #tpu.memory_space<vmem>>, %arg1: memref<5x8x64xbf16, #tpu.memory_space<vmem>>, %arg2: memref<1x1x64xf32, #tpu.memory_space<vmem>>, %arg3: memref<1x1x64xf32, #tpu.memory_space<vmem>>, %arg4: memref<1x1x64xf32, #tpu.memory_space<vmem>>, %arg5: memref<3x64x128xbf16, #tpu.memory_space<vmem>>, %arg6: memref<1x1x128xf32, #tpu.memory_space<vmem>>, %arg7: memref<1x1x128xf32, #tpu.memory_space<vmem>>, %arg8: memref<1x1x128xf32, #tpu.memory_space<vmem>>, %arg9: memref<128x512xbf16, #tpu.memory_space<vmem>>, %arg10: memref<128x512xbf16, #tpu.memory_space<vmem>>, %arg11: memref<1x512xf32, #tpu.memory_space<vmem>>, %arg12: memref<128x128xbf16, #tpu.memory_space<vmem>>, %arg13: memref<1x128xf32, #tpu.memory_space<vmem>>, %arg14: memref<2x128xf32, #tpu.memory_space<vmem>>, %arg15: memref<2x24x64xf32, #tpu.memory_space<vmem>>, %arg16: memref<2x4x512xf32, #tpu.memory_space<vmem>>) attributes {dimension_semantics = [], scalar_prefetch = 0 : i64, scratch_operands = 2 : i64, tpu.core_type = #tpu.core_type<tc>} {
    %cst = arith.constant 0.000000e+00 : f32
    %0 = vector.broadcast %cst : f32 to vector<32x64xf32>
    %c0 = arith.constant 0 : index
    %c0_0 = arith.constant 0 : index
    %c0_1 = arith.constant 0 : index
    %1 = vector.load %arg0[%c0, %c0_0, %c0_1] : memref<2x20x8xf32, #tpu.memory_space<vmem>>, vector<2x16x8xf32>
    %2 = vector.shape_cast %1 : vector<2x16x8xf32> to vector<32x8xf32>
    %3 = arith.truncf %2 : vector<32x8xf32> to vector<32x8xbf16>
    %c0_2 = arith.constant 0 : index
    %c0_3 = arith.constant 0 : index
    %c0_4 = arith.constant 0 : index
    %4 = vector.load %arg1[%c0_2, %c0_3, %c0_4] : memref<5x8x64xbf16, #tpu.memory_space<vmem>>, vector<1x8x64xbf16>
    %5 = vector.shape_cast %4 : vector<1x8x64xbf16> to vector<8x64xbf16>
    %cst_5 = arith.constant dense<0.000000e+00> : vector<32x64xf32>
    %6 = tpu.matmul %3, %5, %cst_5 {dimension_numbers = #tpu.dot_dimension_numbers<[1], [0], [0], [1], [0, 0, 1, 1], [], []>} : vector<32x8xbf16>, vector<8x64xbf16>, vector<32x64xf32> -> vector<32x64xf32>
    %7 = arith.addf %0, %6 : vector<32x64xf32>
    %c0_6 = arith.constant 0 : index
    %c1 = arith.constant 1 : index
    %c0_7 = arith.constant 0 : index
    %8 = vector.load %arg0[%c0_6, %c1, %c0_7] : memref<2x20x8xf32, #tpu.memory_space<vmem>>, vector<2x16x8xf32>
    %9 = vector.shape_cast %8 : vector<2x16x8xf32> to vector<32x8xf32>
    %10 = arith.truncf %9 : vector<32x8xf32> to vector<32x8xbf16>
    %c1_8 = arith.constant 1 : index
    %c0_9 = arith.constant 0 : index
    %c0_10 = arith.constant 0 : index
    %11 = vector.load %arg1[%c1_8, %c0_9, %c0_10] : memref<5x8x64xbf16, #tpu.memory_space<vmem>>, vector<1x8x64xbf16>
    %12 = vector.shape_cast %11 : vector<1x8x64xbf16> to vector<8x64xbf16>
    %cst_11 = arith.constant dense<0.000000e+00> : vector<32x64xf32>
    %13 = tpu.matmul %10, %12, %cst_11 {dimension_numbers = #tpu.dot_dimension_numbers<[1], [0], [0], [1], [0, 0, 1, 1], [], []>} : vector<32x8xbf16>, vector<8x64xbf16>, vector<32x64xf32> -> vector<32x64xf32>
    %14 = arith.addf %7, %13 : vector<32x64xf32>
    %c0_12 = arith.constant 0 : index
    %c2 = arith.constant 2 : index
    %c0_13 = arith.constant 0 : index
    %15 = vector.load %arg0[%c0_12, %c2, %c0_13] : memref<2x20x8xf32, #tpu.memory_space<vmem>>, vector<2x16x8xf32>
    %16 = vector.shape_cast %15 : vector<2x16x8xf32> to vector<32x8xf32>
    %17 = arith.truncf %16 : vector<32x8xf32> to vector<32x8xbf16>
    %c2_14 = arith.constant 2 : index
    %c0_15 = arith.constant 0 : index
    %c0_16 = arith.constant 0 : index
    %18 = vector.load %arg1[%c2_14, %c0_15, %c0_16] : memref<5x8x64xbf16, #tpu.memory_space<vmem>>, vector<1x8x64xbf16>
    %19 = vector.shape_cast %18 : vector<1x8x64xbf16> to vector<8x64xbf16>
    %cst_17 = arith.constant dense<0.000000e+00> : vector<32x64xf32>
    %20 = tpu.matmul %17, %19, %cst_17 {dimension_numbers = #tpu.dot_dimension_numbers<[1], [0], [0], [1], [0, 0, 1, 1], [], []>} : vector<32x8xbf16>, vector<8x64xbf16>, vector<32x64xf32> -> vector<32x64xf32>
    %21 = arith.addf %14, %20 : vector<32x64xf32>
    %c0_18 = arith.constant 0 : index
    %c3 = arith.constant 3 : index
    %c0_19 = arith.constant 0 : index
    %22 = vector.load %arg0[%c0_18, %c3, %c0_19] : memref<2x20x8xf32, #tpu.memory_space<vmem>>, vector<2x16x8xf32>
    %23 = vector.shape_cast %22 : vector<2x16x8xf32> to vector<32x8xf32>
    %24 = arith.truncf %23 : vector<32x8xf32> to vector<32x8xbf16>
    %c3_20 = arith.constant 3 : index
    %c0_21 = arith.constant 0 : index
    %c0_22 = arith.constant 0 : index
    %25 = vector.load %arg1[%c3_20, %c0_21, %c0_22] : memref<5x8x64xbf16, #tpu.memory_space<vmem>>, vector<1x8x64xbf16>
    %26 = vector.shape_cast %25 : vector<1x8x64xbf16> to vector<8x64xbf16>
    %cst_23 = arith.constant dense<0.000000e+00> : vector<32x64xf32>
    %27 = tpu.matmul %24, %26, %cst_23 {dimension_numbers = #tpu.dot_dimension_numbers<[1], [0], [0], [1], [0, 0, 1, 1], [], []>} : vector<32x8xbf16>, vector<8x64xbf16>, vector<32x64xf32> -> vector<32x64xf32>
    %28 = arith.addf %21, %27 : vector<32x64xf32>
    %c0_24 = arith.constant 0 : index
    %c4 = arith.constant 4 : index
    %c0_25 = arith.constant 0 : index
    %29 = vector.load %arg0[%c0_24, %c4, %c0_25] : memref<2x20x8xf32, #tpu.memory_space<vmem>>, vector<2x16x8xf32>
    %30 = vector.shape_cast %29 : vector<2x16x8xf32> to vector<32x8xf32>
    %31 = arith.truncf %30 : vector<32x8xf32> to vector<32x8xbf16>
    %c4_26 = arith.constant 4 : index
    %c0_27 = arith.constant 0 : index
    %c0_28 = arith.constant 0 : index
    %32 = vector.load %arg1[%c4_26, %c0_27, %c0_28] : memref<5x8x64xbf16, #tpu.memory_space<vmem>>, vector<1x8x64xbf16>
    %33 = vector.shape_cast %32 : vector<1x8x64xbf16> to vector<8x64xbf16>
    %cst_29 = arith.constant dense<0.000000e+00> : vector<32x64xf32>
    %34 = tpu.matmul %31, %33, %cst_29 {dimension_numbers = #tpu.dot_dimension_numbers<[1], [0], [0], [1], [0, 0, 1, 1], [], []>} : vector<32x8xbf16>, vector<8x64xbf16>, vector<32x64xf32> -> vector<32x64xf32>
    %35 = arith.addf %28, %34 : vector<32x64xf32>
    %36 = vector.shape_cast %35 : vector<32x64xf32> to vector<2x16x64xf32>
    %c0_30 = arith.constant 0 : index
    %c0_31 = arith.constant 0 : index
    %c0_32 = arith.constant 0 : index
    %37 = vector.load %arg2[%c0_30, %c0_31, %c0_32] : memref<1x1x64xf32, #tpu.memory_space<vmem>>, vector<1x1x64xf32>
    %38 = vector.broadcast %37 : vector<1x1x64xf32> to vector<2x16x64xf32>
    %39 = arith.addf %36, %38 : vector<2x16x64xf32>
    %c0_33 = arith.constant 0 : index
    %c0_34 = arith.constant 0 : index
    %c0_35 = arith.constant 0 : index
    %40 = vector.load %arg3[%c0_33, %c0_34, %c0_35] : memref<1x1x64xf32, #tpu.memory_space<vmem>>, vector<1x1x64xf32>
    %c0_36 = arith.constant 0 : index
    %c0_37 = arith.constant 0 : index
    %c0_38 = arith.constant 0 : index
    %41 = vector.load %arg4[%c0_36, %c0_37, %c0_38] : memref<1x1x64xf32, #tpu.memory_space<vmem>>, vector<1x1x64xf32>
    %cst_39 = arith.constant dense<0.000000e+00> : vector<64xf32>
    %42 = vector.multi_reduction <add>, %39, %cst_39 [0, 1] : vector<2x16x64xf32> to vector<64xf32>
    %43 = vector.shape_cast %42 : vector<64xf32> to vector<1x1x64xf32>
    %cst_40 = arith.constant 3.125000e-02 : f32
    %44 = vector.broadcast %cst_40 : f32 to vector<1x1x64xf32>
    %45 = arith.mulf %43, %44 : vector<1x1x64xf32>
    %46 = vector.broadcast %45 : vector<1x1x64xf32> to vector<2x16x64xf32>
    %47 = arith.subf %39, %46 : vector<2x16x64xf32>
    %48 = arith.mulf %47, %47 : vector<2x16x64xf32>
    %cst_41 = arith.constant dense<0.000000e+00> : vector<64xf32>
    %49 = vector.multi_reduction <add>, %48, %cst_41 [0, 1] : vector<2x16x64xf32> to vector<64xf32>
    %50 = vector.shape_cast %49 : vector<64xf32> to vector<1x1x64xf32>
    %cst_42 = arith.constant 3.125000e-02 : f32
    %51 = vector.broadcast %cst_42 : f32 to vector<1x1x64xf32>
    %52 = arith.mulf %50, %51 : vector<1x1x64xf32>
    %cst_43 = arith.constant 9.99999974E-6 : f32
    %53 = vector.broadcast %cst_43 : f32 to vector<1x1x64xf32>
    %54 = arith.addf %52, %53 : vector<1x1x64xf32>
    %55 = math.rsqrt %54 : vector<1x1x64xf32>
    %56 = vector.broadcast %55 : vector<1x1x64xf32> to vector<2x16x64xf32>
    %57 = arith.mulf %47, %56 : vector<2x16x64xf32>
    %58 = vector.broadcast %40 : vector<1x1x64xf32> to vector<2x16x64xf32>
    %59 = arith.mulf %57, %58 : vector<2x16x64xf32>
    %60 = vector.broadcast %41 : vector<1x1x64xf32> to vector<2x16x64xf32>
    %61 = arith.addf %59, %60 : vector<2x16x64xf32>
    %cst_44 = arith.constant 0.000000e+00 : f32
    %62 = vector.broadcast %cst_44 : f32 to vector<2x16x64xf32>
    %63 = arith.maximumf %61, %62 : vector<2x16x64xf32>
    %64 = vector.shape_cast %63 : vector<2x16x64xf32> to vector<2x8x2x64xf32>
    %65 = vector.extract_strided_slice %64 {offsets = [0, 0, 0, 0], sizes = [2, 8, 1, 64], strides = [1, 1, 1, 1]} : vector<2x8x2x64xf32> to vector<2x8x1x64xf32>
    %66 = vector.shape_cast %65 : vector<2x8x1x64xf32> to vector<2x8x64xf32>
    %67 = vector.extract_strided_slice %64 {offsets = [0, 0, 1, 0], sizes = [2, 8, 1, 64], strides = [1, 1, 1, 1]} : vector<2x8x2x64xf32> to vector<2x8x1x64xf32>
    %68 = vector.shape_cast %67 : vector<2x8x1x64xf32> to vector<2x8x64xf32>
    %69 = arith.maximumf %66, %68 : vector<2x8x64xf32>
    %cst_45 = arith.constant 0.000000e+00 : f32
    %70 = vector.broadcast %cst_45 : f32 to vector<2x8x64xf32>
    %c0_46 = arith.constant 0 : index
    %c0_47 = arith.constant 0 : index
    %c0_48 = arith.constant 0 : index
    %71 = vector.load %arg15[%c0_46, %c0_47, %c0_48] : memref<2x24x64xf32, #tpu.memory_space<vmem>>, vector<2x8x64xf32>
    tpu.vector_store %arg15[%c0_46, %c0_47, %c0_48], %70 {strides = array<i32>} : memref<2x24x64xf32, #tpu.memory_space<vmem>>, vector<2x8x64xf32>,
    %cst_49 = arith.constant 0.000000e+00 : f32
    %72 = vector.broadcast %cst_49 : f32 to vector<2x8x64xf32>
    %c0_50 = arith.constant 0 : index
    %c16 = arith.constant 16 : index
    %c0_51 = arith.constant 0 : index
    %73 = vector.load %arg15[%c0_50, %c16, %c0_51] : memref<2x24x64xf32, #tpu.memory_space<vmem>>, vector<2x8x64xf32>
    tpu.vector_store %arg15[%c0_50, %c16, %c0_51], %72 {strides = array<i32>} : memref<2x24x64xf32, #tpu.memory_space<vmem>>, vector<2x8x64xf32>,
    %c0_52 = arith.constant 0 : index
    %c8 = arith.constant 8 : index
    %c0_53 = arith.constant 0 : index
    %74 = vector.load %arg15[%c0_52, %c8, %c0_53] : memref<2x24x64xf32, #tpu.memory_space<vmem>>, vector<2x8x64xf32>
    tpu.vector_store %arg15[%c0_52, %c8, %c0_53], %69 {strides = array<i32>} : memref<2x24x64xf32, #tpu.memory_space<vmem>>, vector<2x8x64xf32>,
    %cst_54 = arith.constant 0.000000e+00 : f32
    %75 = vector.broadcast %cst_54 : f32 to vector<16x128xf32>
    %c0_55 = arith.constant 0 : index
    %c7 = arith.constant 7 : index
    %c0_56 = arith.constant 0 : index
    %76 = vector.load %arg15[%c0_55, %c7, %c0_56] : memref<2x24x64xf32, #tpu.memory_space<vmem>>, vector<2x8x64xf32>
    %77 = vector.shape_cast %76 : vector<2x8x64xf32> to vector<16x64xf32>
    %78 = arith.truncf %77 : vector<16x64xf32> to vector<16x64xbf16>
    %c0_57 = arith.constant 0 : index
    %c0_58 = arith.constant 0 : index
    %c0_59 = arith.constant 0 : index
    %79 = vector.load %arg5[%c0_57, %c0_58, %c0_59] : memref<3x64x128xbf16, #tpu.memory_space<vmem>>, vector<1x64x128xbf16>
    %80 = vector.shape_cast %79 : vector<1x64x128xbf16> to vector<64x128xbf16>
    %cst_60 = arith.constant dense<0.000000e+00> : vector<16x128xf32>
    %81 = tpu.matmul %78, %80, %cst_60 {dimension_numbers = #tpu.dot_dimension_numbers<[1], [0], [0], [1], [0, 0, 1, 1], [], []>} : vector<16x64xbf16>, vector<64x128xbf16>, vector<16x128xf32> -> vector<16x128xf32>
    %82 = arith.addf %75, %81 : vector<16x128xf32>
    %c0_61 = arith.constant 0 : index
    %c8_62 = arith.constant 8 : index
    %c0_63 = arith.constant 0 : index
    %83 = vector.load %arg15[%c0_61, %c8_62, %c0_63] : memref<2x24x64xf32, #tpu.memory_space<vmem>>, vector<2x8x64xf32>
    %84 = vector.shape_cast %83 : vector<2x8x64xf32> to vector<16x64xf32>
    %85 = arith.truncf %84 : vector<16x64xf32> to vector<16x64xbf16>
    %c1_64 = arith.constant 1 : index
    %c0_65 = arith.constant 0 : index
    %c0_66 = arith.constant 0 : index
    %86 = vector.load %arg5[%c1_64, %c0_65, %c0_66] : memref<3x64x128xbf16, #tpu.memory_space<vmem>>, vector<1x64x128xbf16>
    %87 = vector.shape_cast %86 : vector<1x64x128xbf16> to vector<64x128xbf16>
    %cst_67 = arith.constant dense<0.000000e+00> : vector<16x128xf32>
    %88 = tpu.matmul %85, %87, %cst_67 {dimension_numbers = #tpu.dot_dimension_numbers<[1], [0], [0], [1], [0, 0, 1, 1], [], []>} : vector<16x64xbf16>, vector<64x128xbf16>, vector<16x128xf32> -> vector<16x128xf32>
    %89 = arith.addf %82, %88 : vector<16x128xf32>
    %c0_68 = arith.constant 0 : index
    %c9 = arith.constant 9 : index
    %c0_69 = arith.constant 0 : index
    %90 = vector.load %arg15[%c0_68, %c9, %c0_69] : memref<2x24x64xf32, #tpu.memory_space<vmem>>, vector<2x8x64xf32>
    %91 = vector.shape_cast %90 : vector<2x8x64xf32> to vector<16x64xf32>
    %92 = arith.truncf %91 : vector<16x64xf32> to vector<16x64xbf16>
    %c2_70 = arith.constant 2 : index
    %c0_71 = arith.constant 0 : index
    %c0_72 = arith.constant 0 : index
    %93 = vector.load %arg5[%c2_70, %c0_71, %c0_72] : memref<3x64x128xbf16, #tpu.memory_space<vmem>>, vector<1x64x128xbf16>
    %94 = vector.shape_cast %93 : vector<1x64x128xbf16> to vector<64x128xbf16>
    %cst_73 = arith.constant dense<0.000000e+00> : vector<16x128xf32>
    %95 = tpu.matmul %92, %94, %cst_73 {dimension_numbers = #tpu.dot_dimension_numbers<[1], [0], [0], [1], [0, 0, 1, 1], [], []>} : vector<16x64xbf16>, vector<64x128xbf16>, vector<16x128xf32> -> vector<16x128xf32>
    %96 = arith.addf %89, %95 : vector<16x128xf32>
    %97 = vector.shape_cast %96 : vector<16x128xf32> to vector<2x8x128xf32>
    %c0_74 = arith.constant 0 : index
    %c0_75 = arith.constant 0 : index
    %c0_76 = arith.constant 0 : index
    %98 = vector.load %arg6[%c0_74, %c0_75, %c0_76] : memref<1x1x128xf32, #tpu.memory_space<vmem>>, vector<1x1x128xf32>
    %99 = vector.broadcast %98 : vector<1x1x128xf32> to vector<2x8x128xf32>
    %100 = arith.addf %97, %99 : vector<2x8x128xf32>
    %c0_77 = arith.constant 0 : index
    %c0_78 = arith.constant 0 : index
    %c0_79 = arith.constant 0 : index
    %101 = vector.load %arg7[%c0_77, %c0_78, %c0_79] : memref<1x1x128xf32, #tpu.memory_space<vmem>>, vector<1x1x128xf32>
    %c0_80 = arith.constant 0 : index
    %c0_81 = arith.constant 0 : index
    %c0_82 = arith.constant 0 : index
    %102 = vector.load %arg8[%c0_80, %c0_81, %c0_82] : memref<1x1x128xf32, #tpu.memory_space<vmem>>, vector<1x1x128xf32>
    %cst_83 = arith.constant dense<0.000000e+00> : vector<128xf32>
    %103 = vector.multi_reduction <add>, %100, %cst_83 [0, 1] : vector<2x8x128xf32> to vector<128xf32>
    %104 = vector.shape_cast %103 : vector<128xf32> to vector<1x1x128xf32>
    %cst_84 = arith.constant 6.250000e-02 : f32
    %105 = vector.broadcast %cst_84 : f32 to vector<1x1x128xf32>
    %106 = arith.mulf %104, %105 : vector<1x1x128xf32>
    %107 = vector.broadcast %106 : vector<1x1x128xf32> to vector<2x8x128xf32>
    %108 = arith.subf %100, %107 : vector<2x8x128xf32>
    %109 = arith.mulf %108, %108 : vector<2x8x128xf32>
    %cst_85 = arith.constant dense<0.000000e+00> : vector<128xf32>
    %110 = vector.multi_reduction <add>, %109, %cst_85 [0, 1] : vector<2x8x128xf32> to vector<128xf32>
    %111 = vector.shape_cast %110 : vector<128xf32> to vector<1x1x128xf32>
    %cst_86 = arith.constant 6.250000e-02 : f32
    %112 = vector.broadcast %cst_86 : f32 to vector<1x1x128xf32>
    %113 = arith.mulf %111, %112 : vector<1x1x128xf32>
    %cst_87 = arith.constant 9.99999974E-6 : f32
    %114 = vector.broadcast %cst_87 : f32 to vector<1x1x128xf32>
    %115 = arith.addf %113, %114 : vector<1x1x128xf32>
    %116 = math.rsqrt %115 : vector<1x1x128xf32>
    %117 = vector.broadcast %116 : vector<1x1x128xf32> to vector<2x8x128xf32>
    %118 = arith.mulf %108, %117 : vector<2x8x128xf32>
    %119 = vector.broadcast %101 : vector<1x1x128xf32> to vector<2x8x128xf32>
    %120 = arith.mulf %118, %119 : vector<2x8x128xf32>
    %121 = vector.broadcast %102 : vector<1x1x128xf32> to vector<2x8x128xf32>
    %122 = arith.addf %120, %121 : vector<2x8x128xf32>
    %cst_88 = arith.constant 0.000000e+00 : f32
    %123 = vector.broadcast %cst_88 : f32 to vector<2x8x128xf32>
    %124 = arith.maximumf %122, %123 : vector<2x8x128xf32>
    %125 = vector.shape_cast %124 : vector<2x8x128xf32> to vector<2x4x2x128xf32>
    %126 = vector.extract_strided_slice %125 {offsets = [0, 0, 0, 0], sizes = [2, 4, 1, 128], strides = [1, 1, 1, 1]} : vector<2x4x2x128xf32> to vector<2x4x1x128xf32>
    %127 = vector.shape_cast %126 : vector<2x4x1x128xf32> to vector<2x4x128xf32>
    %128 = vector.extract_strided_slice %125 {offsets = [0, 0, 1, 0], sizes = [2, 4, 1, 128], strides = [1, 1, 1, 1]} : vector<2x4x2x128xf32> to vector<2x4x1x128xf32>
    %129 = vector.shape_cast %128 : vector<2x4x1x128xf32> to vector<2x4x128xf32>
    %130 = arith.maximumf %127, %129 : vector<2x4x128xf32>
    %131 = vector.shape_cast %130 : vector<2x4x128xf32> to vector<8x128xf32>
    %132 = arith.truncf %131 : vector<8x128xf32> to vector<8x128xbf16>
    %c0_89 = arith.constant 0 : index
    %c0_90 = arith.constant 0 : index
    %133 = vector.load %arg9[%c0_89, %c0_90] : memref<128x512xbf16, #tpu.memory_space<vmem>>, vector<128x512xbf16>
    %cst_91 = arith.constant dense<0.000000e+00> : vector<8x512xf32>
    %134 = tpu.matmul %132, %133, %cst_91 {dimension_numbers = #tpu.dot_dimension_numbers<[1], [0], [0], [1], [0, 0, 1, 1], [], []>} : vector<8x128xbf16>, vector<128x512xbf16>, vector<8x512xf32> -> vector<8x512xf32>
    %c0_92 = arith.constant 0 : index
    %c0_93 = arith.constant 0 : index
    %135 = vector.load %arg11[%c0_92, %c0_93] : memref<1x512xf32, #tpu.memory_space<vmem>>, vector<1x512xf32>
    %136 = vector.broadcast %135 : vector<1x512xf32> to vector<8x512xf32>
    %137 = arith.addf %134, %136 : vector<8x512xf32>
    %138 = vector.shape_cast %137 : vector<8x512xf32> to vector<2x4x512xf32>
    %c0_94 = arith.constant 0 : index
    %c0_95 = arith.constant 0 : index
    %c0_96 = arith.constant 0 : index
    %139 = vector.load %arg16[%c0_94, %c0_95, %c0_96] : memref<2x4x512xf32, #tpu.memory_space<vmem>>, vector<2x4x512xf32>
    tpu.vector_store %arg16[%c0_94, %c0_95, %c0_96], %138 {strides = array<i32>} : memref<2x4x512xf32, #tpu.memory_space<vmem>>, vector<2x4x512xf32>,
    %c0_97 = arith.constant 0 : index
    %c0_98 = arith.constant 0 : index
    %140 = vector.load %arg10[%c0_97, %c0_98] : memref<128x512xbf16, #tpu.memory_space<vmem>>, vector<128x512xbf16>
    %cst_99 = arith.constant 0.000000e+00 : bf16
    %141 = vector.broadcast %cst_99 : bf16 to vector<2x128xbf16>
    %cst_100 = arith.constant 0.000000e+00 : f32
    %142 = vector.broadcast %cst_100 : f32 to vector<2x128xf32>
    %c0_i32 = arith.constant 0 : i32
    %c0_101 = arith.constant 0 : index
    %143 = arith.index_cast %c0_i32 : i32 to index
    %c0_102 = arith.constant 0 : index
    %144 = vector.load %arg16[%c0_101, %143, %c0_102] : memref<2x4x512xf32, #tpu.memory_space<vmem>>, vector<2x1x512xf32>
    %145 = vector.shape_cast %144 : vector<2x1x512xf32> to vector<2x512xf32>
    %cst_103 = arith.constant dense<0.000000e+00> : vector<2x512xf32>
    %146 = tpu.matmul %141, %140, %cst_103 {dimension_numbers = #tpu.dot_dimension_numbers<[1], [0], [0], [1], [0, 0, 1, 1], [], []>} : vector<2x128xbf16>, vector<128x512xbf16>, vector<2x512xf32> -> vector<2x512xf32>
    %147 = arith.addf %145, %146 : vector<2x512xf32>
    %148 = vector.extract_strided_slice %147 {offsets = [0, 0], sizes = [2, 128], strides = [1, 1]} : vector<2x512xf32> to vector<2x128xf32>
    %149 = arith.negf %148 : vector<2x128xf32>
    %150 = math.exp %149 : vector<2x128xf32>
    %cst_104 = arith.constant 1.000000e+00 : f32
    %151 = vector.broadcast %cst_104 : f32 to vector<2x128xf32>
    %152 = arith.addf %151, %150 : vector<2x128xf32>
    %153 = arith.divf %151, %152 : vector<2x128xf32>
    %154 = vector.extract_strided_slice %147 {offsets = [0, 128], sizes = [2, 128], strides = [1, 1]} : vector<2x512xf32> to vector<2x128xf32>
    %155 = arith.negf %154 : vector<2x128xf32>
    %156 = math.exp %155 : vector<2x128xf32>
    %cst_105 = arith.constant 1.000000e+00 : f32
    %157 = vector.broadcast %cst_105 : f32 to vector<2x128xf32>
    %158 = arith.addf %157, %156 : vector<2x128xf32>
    %159 = arith.divf %157, %158 : vector<2x128xf32>
    %160 = vector.extract_strided_slice %147 {offsets = [0, 256], sizes = [2, 128], strides = [1, 1]} : vector<2x512xf32> to vector<2x128xf32>
    %161 = math.tanh %160 : vector<2x128xf32>
    %162 = vector.extract_strided_slice %147 {offsets = [0, 384], sizes = [2, 128], strides = [1, 1]} : vector<2x512xf32> to vector<2x128xf32>
    %163 = arith.negf %162 : vector<2x128xf32>
    %164 = math.exp %163 : vector<2x128xf32>
    %cst_106 = arith.constant 1.000000e+00 : f32
    %165 = vector.broadcast %cst_106 : f32 to vector<2x128xf32>
    %166 = arith.addf %165, %164 : vector<2x128xf32>
    %167 = arith.divf %165, %166 : vector<2x128xf32>
    %168 = arith.mulf %159, %142 : vector<2x128xf32>
    %169 = arith.mulf %153, %161 : vector<2x128xf32>
    %170 = arith.addf %168, %169 : vector<2x128xf32>
    %171 = math.tanh %170 : vector<2x128xf32>
    %172 = arith.mulf %167, %171 : vector<2x128xf32>
    %173 = arith.truncf %172 : vector<2x128xf32> to vector<2x128xbf16>
    %c1_i32 = arith.constant 1 : i32
    %c0_107 = arith.constant 0 : index
    %174 = arith.index_cast %c1_i32 : i32 to index
    %c0_108 = arith.constant 0 : index
    %175 = vector.load %arg16[%c0_107, %174, %c0_108] : memref<2x4x512xf32, #tpu.memory_space<vmem>>, vector<2x1x512xf32>
    %176 = vector.shape_cast %175 : vector<2x1x512xf32> to vector<2x512xf32>
    %cst_109 = arith.constant dense<0.000000e+00> : vector<2x512xf32>
    %177 = tpu.matmul %173, %140, %cst_109 {dimension_numbers = #tpu.dot_dimension_numbers<[1], [0], [0], [1], [0, 0, 1, 1], [], []>} : vector<2x128xbf16>, vector<128x512xbf16>, vector<2x512xf32> -> vector<2x512xf32>
    %178 = arith.addf %176, %177 : vector<2x512xf32>
    %179 = vector.extract_strided_slice %178 {offsets = [0, 0], sizes = [2, 128], strides = [1, 1]} : vector<2x512xf32> to vector<2x128xf32>
    %180 = arith.negf %179 : vector<2x128xf32>
    %181 = math.exp %180 : vector<2x128xf32>
    %cst_110 = arith.constant 1.000000e+00 : f32
    %182 = vector.broadcast %cst_110 : f32 to vector<2x128xf32>
    %183 = arith.addf %182, %181 : vector<2x128xf32>
    %184 = arith.divf %182, %183 : vector<2x128xf32>
    %185 = vector.extract_strided_slice %178 {offsets = [0, 128], sizes = [2, 128], strides = [1, 1]} : vector<2x512xf32> to vector<2x128xf32>
    %186 = arith.negf %185 : vector<2x128xf32>
    %187 = math.exp %186 : vector<2x128xf32>
    %cst_111 = arith.constant 1.000000e+00 : f32
    %188 = vector.broadcast %cst_111 : f32 to vector<2x128xf32>
    %189 = arith.addf %188, %187 : vector<2x128xf32>
    %190 = arith.divf %188, %189 : vector<2x128xf32>
    %191 = vector.extract_strided_slice %178 {offsets = [0, 256], sizes = [2, 128], strides = [1, 1]} : vector<2x512xf32> to vector<2x128xf32>
    %192 = math.tanh %191 : vector<2x128xf32>
    %193 = vector.extract_strided_slice %178 {offsets = [0, 384], sizes = [2, 128], strides = [1, 1]} : vector<2x512xf32> to vector<2x128xf32>
    %194 = arith.negf %193 : vector<2x128xf32>
    %195 = math.exp %194 : vector<2x128xf32>
    %cst_112 = arith.constant 1.000000e+00 : f32
    %196 = vector.broadcast %cst_112 : f32 to vector<2x128xf32>
    %197 = arith.addf %196, %195 : vector<2x128xf32>
    %198 = arith.divf %196, %197 : vector<2x128xf32>
    %199 = arith.mulf %190, %170 : vector<2x128xf32>
    %200 = arith.mulf %184, %192 : vector<2x128xf32>
    %201 = arith.addf %199, %200 : vector<2x128xf32>
    %202 = math.tanh %201 : vector<2x128xf32>
    %203 = arith.mulf %198, %202 : vector<2x128xf32>
    %204 = arith.truncf %203 : vector<2x128xf32> to vector<2x128xbf16>
    %c2_i32 = arith.constant 2 : i32
    %c0_113 = arith.constant 0 : index
    %205 = arith.index_cast %c2_i32 : i32 to index
    %c0_114 = arith.constant 0 : index
    %206 = vector.load %arg16[%c0_113, %205, %c0_114] : memref<2x4x512xf32, #tpu.memory_space<vmem>>, vector<2x1x512xf32>
    %207 = vector.shape_cast %206 : vector<2x1x512xf32> to vector<2x512xf32>
    %cst_115 = arith.constant dense<0.000000e+00> : vector<2x512xf32>
    %208 = tpu.matmul %204, %140, %cst_115 {dimension_numbers = #tpu.dot_dimension_numbers<[1], [0], [0], [1], [0, 0, 1, 1], [], []>} : vector<2x128xbf16>, vector<128x512xbf16>, vector<2x512xf32> -> vector<2x512xf32>
    %209 = arith.addf %207, %208 : vector<2x512xf32>
    %210 = vector.extract_strided_slice %209 {offsets = [0, 0], sizes = [2, 128], strides = [1, 1]} : vector<2x512xf32> to vector<2x128xf32>
    %211 = arith.negf %210 : vector<2x128xf32>
    %212 = math.exp %211 : vector<2x128xf32>
    %cst_116 = arith.constant 1.000000e+00 : f32
    %213 = vector.broadcast %cst_116 : f32 to vector<2x128xf32>
    %214 = arith.addf %213, %212 : vector<2x128xf32>
    %215 = arith.divf %213, %214 : vector<2x128xf32>
    %216 = vector.extract_strided_slice %209 {offsets = [0, 128], sizes = [2, 128], strides = [1, 1]} : vector<2x512xf32> to vector<2x128xf32>
    %217 = arith.negf %216 : vector<2x128xf32>
    %218 = math.exp %217 : vector<2x128xf32>
    %cst_117 = arith.constant 1.000000e+00 : f32
    %219 = vector.broadcast %cst_117 : f32 to vector<2x128xf32>
    %220 = arith.addf %219, %218 : vector<2x128xf32>
    %221 = arith.divf %219, %220 : vector<2x128xf32>
    %222 = vector.extract_strided_slice %209 {offsets = [0, 256], sizes = [2, 128], strides = [1, 1]} : vector<2x512xf32> to vector<2x128xf32>
    %223 = math.tanh %222 : vector<2x128xf32>
    %224 = vector.extract_strided_slice %209 {offsets = [0, 384], sizes = [2, 128], strides = [1, 1]} : vector<2x512xf32> to vector<2x128xf32>
    %225 = arith.negf %224 : vector<2x128xf32>
    %226 = math.exp %225 : vector<2x128xf32>
    %cst_118 = arith.constant 1.000000e+00 : f32
    %227 = vector.broadcast %cst_118 : f32 to vector<2x128xf32>
    %228 = arith.addf %227, %226 : vector<2x128xf32>
    %229 = arith.divf %227, %228 : vector<2x128xf32>
    %230 = arith.mulf %221, %201 : vector<2x128xf32>
    %231 = arith.mulf %215, %223 : vector<2x128xf32>
    %232 = arith.addf %230, %231 : vector<2x128xf32>
    %233 = math.tanh %232 : vector<2x128xf32>
    %234 = arith.mulf %229, %233 : vector<2x128xf32>
    %235 = arith.truncf %234 : vector<2x128xf32> to vector<2x128xbf16>
    %c3_i32 = arith.constant 3 : i32
    %c0_119 = arith.constant 0 : index
    %236 = arith.index_cast %c3_i32 : i32 to index
    %c0_120 = arith.constant 0 : index
    %237 = vector.load %arg16[%c0_119, %236, %c0_120] : memref<2x4x512xf32, #tpu.memory_space<vmem>>, vector<2x1x512xf32>
    %238 = vector.shape_cast %237 : vector<2x1x512xf32> to vector<2x512xf32>
    %cst_121 = arith.constant dense<0.000000e+00> : vector<2x512xf32>
    %239 = tpu.matmul %235, %140, %cst_121 {dimension_numbers = #tpu.dot_dimension_numbers<[1], [0], [0], [1], [0, 0, 1, 1], [], []>} : vector<2x128xbf16>, vector<128x512xbf16>, vector<2x512xf32> -> vector<2x512xf32>
    %240 = arith.addf %238, %239 : vector<2x512xf32>
    %241 = vector.extract_strided_slice %240 {offsets = [0, 0], sizes = [2, 128], strides = [1, 1]} : vector<2x512xf32> to vector<2x128xf32>
    %242 = arith.negf %241 : vector<2x128xf32>
    %243 = math.exp %242 : vector<2x128xf32>
    %cst_122 = arith.constant 1.000000e+00 : f32
    %244 = vector.broadcast %cst_122 : f32 to vector<2x128xf32>
    %245 = arith.addf %244, %243 : vector<2x128xf32>
    %246 = arith.divf %244, %245 : vector<2x128xf32>
    %247 = vector.extract_strided_slice %240 {offsets = [0, 128], sizes = [2, 128], strides = [1, 1]} : vector<2x512xf32> to vector<2x128xf32>
    %248 = arith.negf %247 : vector<2x128xf32>
    %249 = math.exp %248 : vector<2x128xf32>
    %cst_123 = arith.constant 1.000000e+00 : f32
    %250 = vector.broadcast %cst_123 : f32 to vector<2x128xf32>
    %251 = arith.addf %250, %249 : vector<2x128xf32>
    %252 = arith.divf %250, %251 : vector<2x128xf32>
    %253 = vector.extract_strided_slice %240 {offsets = [0, 256], sizes = [2, 128], strides = [1, 1]} : vector<2x512xf32> to vector<2x128xf32>
    %254 = math.tanh %253 : vector<2x128xf32>
    %255 = vector.extract_strided_slice %240 {offsets = [0, 384], sizes = [2, 128], strides = [1, 1]} : vector<2x512xf32> to vector<2x128xf32>
    %256 = arith.negf %255 : vector<2x128xf32>
    %257 = math.exp %256 : vector<2x128xf32>
    %cst_124 = arith.constant 1.000000e+00 : f32
    %258 = vector.broadcast %cst_124 : f32 to vector<2x128xf32>
    %259 = arith.addf %258, %257 : vector<2x128xf32>
    %260 = arith.divf %258, %259 : vector<2x128xf32>
    %261 = arith.mulf %252, %232 : vector<2x128xf32>
    %262 = arith.mulf %246, %254 : vector<2x128xf32>
    %263 = arith.addf %261, %262 : vector<2x128xf32>
    %264 = math.tanh %263 : vector<2x128xf32>
    %265 = arith.mulf %260, %264 : vector<2x128xf32>
    %266 = arith.truncf %265 : vector<2x128xf32> to vector<2x128xbf16>
    %c4_i32 = arith.constant 4 : i32
    %c0_125 = arith.constant 0 : index
    %c0_126 = arith.constant 0 : index
    %267 = vector.load %arg12[%c0_125, %c0_126] : memref<128x128xbf16, #tpu.memory_space<vmem>>, vector<128x128xbf16>
    %cst_127 = arith.constant dense<0.000000e+00> : vector<2x128xf32>
    %268 = tpu.matmul %266, %267, %cst_127 {dimension_numbers = #tpu.dot_dimension_numbers<[1], [0], [0], [1], [0, 0, 1, 1], [], []>} : vector<2x128xbf16>, vector<128x128xbf16>, vector<2x128xf32> -> vector<2x128xf32>
    %c0_128 = arith.constant 0 : index
    %c0_129 = arith.constant 0 : index
    %269 = vector.load %arg13[%c0_128, %c0_129] : memref<1x128xf32, #tpu.memory_space<vmem>>, vector<1x128xf32>
    %270 = vector.broadcast %269 : vector<1x128xf32> to vector<2x128xf32>
    %271 = arith.addf %268, %270 : vector<2x128xf32>
    %c0_130 = arith.constant 0 : index
    %c0_131 = arith.constant 0 : index
    %272 = vector.load %arg14[%c0_130, %c0_131] : memref<2x128xf32, #tpu.memory_space<vmem>>, vector<2x128xf32>
    tpu.vector_store %arg14[%c0_130, %c0_131], %271 {strides = array<i32>} : memref<2x128xf32, #tpu.memory_space<vmem>>, vector<2x128xf32>,
    return
  }
}

</mosaic_0001>

<bundles_post_ra>
// kernel: cnn_lstm_forward.1
= control target key start
LH: loop header
LB: loop body
LE: loop exit
PB: predicated region body
PF: predicated region fallthrough
CT: control target
= control target key end

     0   :  { %19 = vsyncpa [#allocation5], 0  ;;  %s4175_s0 = inlined_call_operand.vmem [shape: f32[2,20,8], index: 0, kind: input, shape index: {}]   ;;  %s4176_s1 = inlined_call_operand.hbm [shape: bf16[5,8,64], index: 1, kind: input, shape index: {}]   ;;  %s4177_s2 = inlined_call_operand.vmem [shape: f32[1,1,64], index: 2, kind: input, shape index: {}]   ;;  %s4178_s3 = inlined_call_operand.vmem [shape: f32[1,1,64], index: 3, kind: input, shape index: {}]   ;;  %s4179_s4 = inlined_call_operand.hbm [shape: f32[1,1,64], index: 4, kind: input, shape index: {}]   ;;  %s4180_s5 = inlined_call_operand.vmem [shape: bf16[3,64,128], index: 5, kind: input, shape index: {}]   ;;  %s4181_s6 = inlined_call_operand.hbm [shape: f32[1,1,128], index: 6, kind: input, shape index: {}]   ;;  %s4182_s7 = inlined_call_operand.hbm [shape: f32[1,1,128], index: 7, kind: input, shape index: {}]   ;;  %s4183_s8 = inlined_call_operand.hbm [shape: f32[1,1,128], index: 8, kind: input, shape index: {}]   ;;  %s4184_s9 = inlined_call_operand.hbm [shape: bf16[128,512], index: 9, kind: input, shape index: {}]   ;;  %s4185_s10 = inlined_call_operand.hbm [shape: bf16[128,512], index: 10, kind: input, shape index: {}]   ;;  %s4186_s11 = inlined_call_operand.vmem [shape: f32[1,512], index: 11, kind: input, shape index: {}]   ;;  %s4187_s12 = inlined_call_operand.vmem [shape: bf16[128,128], index: 12, kind: input, shape index: {}]   ;;  %s4188_s13 = inlined_call_operand.hbm [shape: f32[1,128], index: 13, kind: input, shape index: {}]   ;;  %s4189_s14 = inlined_call_operand.hbm [shape: f32[2,128], index: 14, kind: output, shape index: {}]  }
   0x1   :  { %20 = vsyncpa [#allocation8], 0 }
   0x2   :  { %21 = vsyncpa [#allocation11], 0 }
   0x3   :  { %22 = vsyncpa [#allocation14], 0 }
   0x4   :  { %23 = vsyncpa [#allocation17], 0 }
   0x5   :  { %24 = vsyncpa [#allocation6], 0  ;;  %s3458_s29 = smov [#allocation7]   ;;  %s3459_s15 = smov [#allocation10]  }
   0x6   :  { %s49_s30 = sshll.u32 %s3458_s29, 4  ;;  %s71_s16 = sshll.u32 %s3459_s15, 4  ;;  %s50_s30 = int_to_ptr.vmem [resolvable:$true] %s49_s30  ;;  %s72_s16 = int_to_ptr.vmem [resolvable:$true] %s71_s16 }
   0x7   :  { %s3248_s19 = scalar_lea.hbm %s4179_s4, 16 }
   0x8   :  { %p3249_p0 = scmp.ne.s32.totalorder %s4179_s4, %s3248_s19  ;;  %p3252_p1 = scmp.lt.u32.totalorder %s3248_s19, %s4179_s4 }
   0xa   :  { %p3254_p2 = pnand %p3252_p1, %p3249_p0 }
   0xc   :  { %3257 = shalt.err (!%p3254_p2)
}
   0xd   :  { %s3258_s24 = scalar_lea.vmem %s50_s30, 16  ;;  %s3262_s25 = scalar_lea.vmem %s50_s30, 32 }
   0xe   :  { %p3259_p3 = scmp.ne.s32.totalorder %s50_s30, %s3258_s24  ;;  %p3263_p4 = scmp.lt.s32.totalorder %s50_s30, %s50_s30 }
   0xf   :  { %p3264_p5 = scmp.lt.s32.totalorder %s3262_s25, %s3258_s24 }
  0x11   :  { %p3265_p6 = por %p3264_p5, %p3263_p4 }
  0x13   :  { %p3266_p7 = pnand %p3265_p6, %p3259_p3 }
  0x15   :  { %3269 = shalt.err (!%p3266_p7)
}
  0x16   :  { %52 = dma.hbm_to_vmem [thread:$0]  %s4179_s4, 16, %s50_s30, [#allocation8]  }
  0x17   :  { %s3270_s15 = scalar_lea.hbm %s4182_s7, 16 }
  0x18   :  { %p3271_p8 = scmp.ne.s32.totalorder %s4182_s7, %s3270_s15  ;;  %p3274_p9 = scmp.lt.u32.totalorder %s3270_s15, %s4182_s7 }
  0x1a   :  { %p3276_p10 = pnand %p3274_p9, %p3271_p8 }
  0x1c   :  { %3279 = shalt.err (!%p3276_p10)
}
  0x1d   :  { %s3280_s21 = scalar_lea.vmem %s72_s16, 16  ;;  %s3284_s22 = scalar_lea.vmem %s72_s16, 32 }
  0x1e   :  { %p3281_p11 = scmp.ne.s32.totalorder %s72_s16, %s3280_s21  ;;  %p3285_p12 = scmp.lt.s32.totalorder %s72_s16, %s72_s16 }
  0x1f   :  { %p3286_p13 = scmp.lt.s32.totalorder %s3284_s22, %s3280_s21 }
  0x21   :  { %p3287_p0 = por %p3286_p13, %p3285_p12 }
  0x23   :  { %p3288_p1 = pnand %p3287_p0, %p3281_p11 }
  0x25   :  { %3291 = shalt.err (!%p3288_p1)
}
  0x26   :  { %74 = dma.hbm_to_vmem [thread:$0]  %s4182_s7, 16, %s72_s16, [#allocation11]  }
  0x27   :  { %s3460_s23 = smov [#allocation13]   ;;  %s3292_s27 = scalar_lea.hbm %s4184_s9, 4096 }
  0x28   :  { %s90_s24 = sshll.u32 %s3460_s23, 4  ;;  %p3293_p2 = scmp.ne.s32.totalorder %s4184_s9, %s3292_s27  ;;  %s91_s24 = int_to_ptr.vmem [resolvable:$true] %s90_s24 }
  0x29   :  { %p3296_p3 = scmp.lt.u32.totalorder %s3292_s27, %s4184_s9 }
  0x2b   :  { %p3298_p4 = pnand %p3296_p3, %p3293_p2 }
  0x2d   :  { %3301 = shalt.err (!%p3298_p4)
}
  0x2e   :  { %s3302_s18 = scalar_lea.vmem %s91_s24, 4096  ;;  %p3307_p6 = scmp.lt.s32.totalorder %s91_s24, %s91_s24 }
  0x2f   :  { %p3303_p5 = scmp.ne.s32.totalorder %s91_s24, %s3302_s18  ;;  %p3308_p7 = scmp.lt.s32.totalorder %s3302_s18, %s3302_s18 }
  0x31   :  { %p3309_p8 = por %p3308_p7, %p3307_p6 }
  0x33   :  { %p3310_p9 = pnand %p3309_p8, %p3303_p5 }
  0x35   :  { %3313 = shalt.err (!%p3310_p9)
}
  0x36   :  { %s3461_s7 = smov 256   ;;  %s3462_s16 = smov 16  }
  0x37   :  { %96 = dma.hbm_to_vmem [thread:$0]  %s4184_s9, 4096, %s91_s24, [#allocation14], %s3461_s7, %s3461_s7, %s3462_s16  }
  0x38   :  { %s3463_s21 = smov [#allocation4]   ;;  %s3314_s23 = scalar_lea.hbm %s4176_s1, 320 }
  0x39   :  { %s32_s22 = sshll.u32 %s3463_s21, 4  ;;  %p3315_p10 = scmp.ne.s32.totalorder %s4176_s1, %s3314_s23  ;;  %s33_s22 = int_to_ptr.vmem [resolvable:$true] %s32_s22 }
  0x3a   :  { %p3318_p11 = scmp.lt.u32.totalorder %s3314_s23, %s4176_s1 }
  0x3c   :  { %p3320_p12 = pnand %p3318_p11, %p3315_p10 }
  0x3e   :  { %3323 = shalt.err (!%p3320_p12)
}
  0x3f   :  { %s3324_s29 = scalar_lea.vmem %s33_s22, 320  ;;  %p3329_p0 = scmp.lt.s32.totalorder %s33_s22, %s33_s22 }
  0x40   :  { %p3325_p13 = scmp.ne.s32.totalorder %s33_s22, %s3324_s29  ;;  %p3330_p1 = scmp.lt.s32.totalorder %s3324_s29, %s3324_s29 }
  0x42   :  { %p3331_p2 = por %p3330_p1, %p3329_p0 }
  0x44   :  { %p3332_p3 = pnand %p3331_p2, %p3325_p13 }
  0x46   :  { %3335 = shalt.err (!%p3332_p3)
}
  0x47   :  { %s3464_s9 = smov 64   ;;  %s3465_s24 = smov 4  }
  0x48   :  { %38 = dma.hbm_to_vmem [thread:$0]  %s4176_s1, 320, %s33_s22, [#allocation5], %s3464_s9, %s3464_s9, %s3465_s24  }
  0x49   :  { %s3466_s18 = smov [#allocation9]   ;;  %s3467_s20 = smov [#allocation12]  }
  0x4a   :  { %s61_s19 = sshll.u32 %s3466_s18, 4  ;;  %s81_s21 = sshll.u32 %s3467_s20, 4  ;;  %s62_s19 = int_to_ptr.vmem [resolvable:$true] %s61_s19  ;;  %s82_s21 = int_to_ptr.vmem [resolvable:$true] %s81_s21 }
  0x4b   :  { %s3336_s23 = scalar_lea.hbm %s4181_s6, 16 }
  0x4c   :  { %p3337_p4 = scmp.ne.s32.totalorder %s4181_s6, %s3336_s23  ;;  %p3340_p5 = scmp.lt.u32.totalorder %s3336_s23, %s4181_s6 }
  0x4e   :  { %p3342_p6 = pnand %p3340_p5, %p3337_p4 }
  0x50   :  { %3345 = shalt.err (!%p3342_p6)
}
  0x51   :  { %s3346_s1 = scalar_lea.vmem %s62_s19, 16  ;;  %s3350_s22 = scalar_lea.vmem %s62_s19, 32 }
  0x52   :  { %p3347_p7 = scmp.ne.s32.totalorder %s62_s19, %s3346_s1  ;;  %p3351_p8 = scmp.lt.s32.totalorder %s62_s19, %s62_s19 }
  0x53   :  { %p3352_p9 = scmp.lt.s32.totalorder %s3350_s22, %s3346_s1 }
  0x55   :  { %p3353_p10 = por %p3352_p9, %p3351_p8 }
  0x57   :  { %p3354_p11 = pnand %p3353_p10, %p3347_p7 }
  0x59   :  { %3357 = shalt.err (!%p3354_p11)
}
  0x5a   :  { %64 = dma.hbm_to_vmem [thread:$0]  %s4181_s6, 16, %s62_s19, [#allocation8]  }
  0x5b   :  { %s3358_s17 = scalar_lea.hbm %s4183_s8, 16 }
  0x5c   :  { %p3359_p12 = scmp.ne.s32.totalorder %s4183_s8, %s3358_s17  ;;  %p3362_p13 = scmp.lt.u32.totalorder %s3358_s17, %s4183_s8 }
  0x5e   :  { %p3364_p0 = pnand %p3362_p13, %p3359_p12 }
  0x60   :  { %3367 = shalt.err (!%p3364_p0)
}
  0x61   :  { %s3368_s23 = scalar_lea.vmem %s82_s21, 16  ;;  %s3372_s25 = scalar_lea.vmem %s82_s21, 32 }
  0x62   :  { %p3369_p1 = scmp.ne.s32.totalorder %s82_s21, %s3368_s23  ;;  %p3373_p2 = scmp.lt.s32.totalorder %s82_s21, %s82_s21 }
  0x63   :  { %p3374_p3 = scmp.lt.s32.totalorder %s3372_s25, %s3368_s23 }
  0x65   :  { %p3375_p4 = por %p3374_p3, %p3373_p2 }
  0x67   :  { %p3376_p5 = pnand %p3375_p4, %p3369_p1 }
  0x69   :  { %3379 = shalt.err (!%p3376_p5)
}
  0x6a   :  { %84 = dma.hbm_to_vmem [thread:$0]  %s4183_s8, 16, %s82_s21, [#allocation11]  }
  0x6b   :  { %s3468_s26 = smov [#allocation15]   ;;  %s3469_s28 = smov [#allocation16]  }
  0x6c   :  { %s102_s27 = sshll.u32 %s3468_s26, 4  ;;  %s119_s1 = sshll.u32 %s3469_s28, 4  ;;  %s103_s27 = int_to_ptr.vmem [resolvable:$true] %s102_s27  ;;  %s120_s1 = int_to_ptr.vmem [resolvable:$true] %s119_s1 }
  0x6d   :  { %s3380_s9 = scalar_lea.hbm %s4185_s10, 4096 }
  0x6e   :  { %p3381_p6 = scmp.ne.s32.totalorder %s4185_s10, %s3380_s9  ;;  %p3384_p7 = scmp.lt.u32.totalorder %s3380_s9, %s4185_s10 }
  0x70   :  { %p3386_p8 = pnand %p3384_p7, %p3381_p6 }
  0x72   :  { %3389 = shalt.err (!%p3386_p8)
}
  0x73   :  { %s3390_s8 = scalar_lea.vmem %s103_s27, 4096  ;;  %p3395_p10 = scmp.lt.s32.totalorder %s103_s27, %s103_s27 }
  0x74   :  { %p3391_p9 = scmp.ne.s32.totalorder %s103_s27, %s3390_s8  ;;  %p3396_p11 = scmp.lt.s32.totalorder %s3390_s8, %s3390_s8 }
  0x76   :  { %p3397_p12 = por %p3396_p11, %p3395_p10 }
  0x78   :  { %p3398_p13 = pnand %p3397_p12, %p3391_p9 }
  0x7a   :  { %3401 = shalt.err (!%p3398_p13)
}
  0x7b   :  { %108 = dma.hbm_to_vmem [thread:$0]  %s4185_s10, 4096, %s103_s27, [#allocation14], %s3461_s7, %s3461_s7, %s3462_s16  }
  0x7c   :  { %s3402_s23 = scalar_lea.hbm %s4188_s13, 16 }
  0x7d   :  { %p3403_p0 = scmp.ne.s32.totalorder %s4188_s13, %s3402_s23  ;;  %p3406_p1 = scmp.lt.u32.totalorder %s3402_s23, %s4188_s13 }
  0x7f   :  { %p3408_p2 = pnand %p3406_p1, %p3403_p0 }
  0x81   :  { %3411 = shalt.err (!%p3408_p2)
}
  0x82   :  { %s3412_s28 = scalar_lea.vmem %s120_s1, 16  ;;  %s3416_s22 = scalar_lea.vmem %s120_s1, 32 }
  0x83   :  { %p3413_p3 = scmp.ne.s32.totalorder %s120_s1, %s3412_s28  ;;  %p3417_p4 = scmp.lt.s32.totalorder %s120_s1, %s120_s1 }
  0x84   :  { %p3418_p5 = scmp.lt.s32.totalorder %s3416_s22, %s3412_s28 }
  0x86   :  { %p3419_p6 = por %p3418_p5, %p3417_p4 }
  0x88   :  { %p3420_p7 = pnand %p3419_p6, %p3413_p3 }
  0x8a   :  { %3423 = shalt.err (!%p3420_p7)
}
  0x8b   :  { %122 = dma.hbm_to_vmem [thread:$0]  %s4188_s13, 16, %s120_s1, [#allocation17]  }
  0x8c   :  { %3446 = dma.done.wait [#allocation5], 320  }
  0x8d   :  { %3447 = vsyncadd [#allocation5], 4294966976 }
  0x8e   :  { %3448 = dma.done.wait [#allocation8], 32  }
  0x8f   :  { %3449 = vsyncadd [#allocation8], 4294967264 }
  0x90   :  { %3450 = dma.done.wait [#allocation11], 32  }
  0x91   :  { %3451 = vsyncadd [#allocation11], 4294967264 }
  0x92   :  { %3452 = dma.done.wait [#allocation14], 8192  }
  0x93   :  { %3453 = vsyncadd [#allocation14], 4294959104 }
  0x94   :  { %3454 = dma.done.wait [#allocation17], 16  }
  0x95   :  { %3455 = vsyncadd [#allocation17], 4294967280  ;;  %vm170_vm0 = vcmask 1043456   ;;  %v154_v0 = vld [vmem:[#allocation4] sm:$0xf]  ;;  %v149_v2 = vld [vmem:[%s4175_s0 + $0x8] sm:$0xff] }
  0x96   :  { %v148_v1 = vld [vmem:[%s4175_s0] sm:$0xff]  ;;  %vm163_vm1 = vcmask 64512   ;;  %2978 = vmatprep.subr.msk.bf16.mxu0 %vm170_vm0, %v154_v0  ;;  %v230_v3 = vsel %vm170_vm0, %v154_v0, 0  ;;  %v150_v5 = vld [vmem:[%s4175_s0 + $0x18] sm:$0xff]  ;;  %v288_v7 = vld [vmem:[#allocation4 + $0x8] sm:$0xf] }
  0x97   :  { %v152_v4 = vpack.c.bf16 %v149_v2, %v148_v1  ;;  %v151_v6 = vld [vmem:[%s4175_s0 + $0x20] sm:$0xff]  ;;  %2882 = vmatpush3.bf16.msra.mxu0 %v230_v3  ;;  %v282_v10 = vld [vmem:[%s4175_s0 + $0xa] sm:$0xff]  ;;  %v296_v11 = vsel %vm170_vm0, %v288_v7, 0  ;;  %vm504_vm2 = vcmask 523264   ;;  %v3470_v41 = vmov 0.0   ;;  %v3003_v48 = vld [vmem:[%s4180_s5 + $0x38] sm:$0xff]  }
  0x98   :  { %v153_v8 = vpack.c.bf16 %v151_v6, %v150_v5  ;;  %v281_v9 = vld [vmem:[%s4175_s0 + $0x2] sm:$0xff]  ;;  %2979 = vmatprep.subr.msk.bf16.mxu0 %vm170_vm0, %v288_v7  ;;  %v358_v13 = vld [vmem:[#allocation4 + $0xc] sm:$0xf]  ;;  %v157_v18 = vld [vmem:[%s4175_s0 + $0x19] sm:$0xff]  ;;  %723 = vst.msk [vmem:[#allocation2] sm:$0xff] %vm504_vm2, %v3470_v41  ;;  %vm3471_vm3 = vmmov 0  }
  0x99   :  { %2883 = vmatprep.mubr.msk.bf16.mxu0 %vm163_vm1, %v152_v4  ;;  %v285_v12 = vpack.c.bf16 %v282_v10, %v281_v9  ;;  %v162_v14 = vld [vmem:[#allocation4 + $0x4] sm:$0xf]  ;;  %v156_v17 = vld [vmem:[%s4175_s0 + $0x9] sm:$0xff]  ;;  %v283_v22 = vld [vmem:[%s4175_s0 + $0x1a] sm:$0xff]  ;;  %v366_v24 = vsel %vm170_vm0, %v358_v13, 0  ;;  %724 = vst.msk [vmem:[#allocation2 + $0x18] sm:$0xff] %vm504_vm2, %v3470_v41 }
  0x9a   :  { %2884 = vmatmul.mubr.msk.bf16.vlgmr.msra.gmra.mrb[0].mxu0 %vm163_vm1, %v153_v8  ;;  %v155_v15 = vld [vmem:[%s4175_s0 + $0x1] sm:$0xff]  ;;  %v172_v16 = vsel %vm170_vm0, %v162_v14, 0  ;;  %2977 = vmatprep.subr.msk.bf16.mxu1 %vm170_vm0, %v162_v14  ;;  %v352_v26 = vld [vmem:[%s4175_s0 + $0xb] sm:$0xff]  ;;  %725 = vst.msk [vmem:[#allocation2 + $0x10] sm:$0xff] %vm504_vm2, %v3470_v41  ;;  %726 = vst.msk [vmem:[#allocation2 + $0x28] sm:$0xff] %vm504_vm2, %v3470_v41  ;;  %vm807_vm4 = vcmask 1041409  }
  0x9b   :  { %2888 = vmatpush3.bf16.msra.mxu0 %v296_v11  ;;  %2889 = vmatprep.mubr.msk.bf16.mxu0 %vm163_vm1, %v285_v12  ;;  %v158_v19 = vld [vmem:[%s4175_s0 + $0x21] sm:$0xff]  ;;  %v159_v20 = vpack.c.bf16 %v156_v17, %v155_v15  ;;  %v428_v29 = vld [vmem:[#allocation4 + $0x10] sm:$0xf]  ;;  %v2678_v51 = vld [vmem:[%s4177_s2] ss:$0 sm:$0xff]  ;;  %vm809_vm5 = vcmask 1042434  }
  0x9c   :  { %2980 = vmatprep.subr.msk.bf16.mxu0 %vm170_vm0, %v358_v13  ;;  %v160_v21 = vpack.c.bf16 %v158_v19, %v157_v18  ;;  %v284_v23 = vld [vmem:[%s4175_s0 + $0x22] sm:$0xff]  ;;  %2876 = vmatpush3.bf16.msra.mxu1 %v172_v16  ;;  %v422_v33 = vld [vmem:[%s4175_s0 + $0xc] sm:$0xff]  ;;  %v436_v36 = vsel %vm170_vm0, %v428_v29, 0  ;;  %vm811_vm6 = vcmask 1043459   ;;  %vm813_vm7 = vcmask 1044484  }
  0x9d   :  { %v351_v25 = vld [vmem:[%s4175_s0 + $0x3] sm:$0xff]  ;;  %2877 = vmatprep.mubr.msk.bf16.mxu1 %vm163_vm1, %v159_v20  ;;  %v286_v27 = vpack.c.bf16 %v284_v23, %v283_v22  ;;  %v353_v30 = vld [vmem:[%s4175_s0 + $0x1b] sm:$0xff]  ;;  %2905 = vmatprep.subr.bf16.mxu1 %v3470_v41  ;;  %v3002_v46 = vld [vmem:[%s4180_s5 + $0x30] sm:$0xff]   ;;  %vm815_vm8 = vcmask 1045509   ;;  %vm817_vm9 = vcmask 1046534   ;;  %vm819_vm10 = vcmask 1047559  }
  0x9e   :  { %v355_v28 = vpack.c.bf16 %v352_v26, %v351_v25  ;;  %v354_v31 = vld [vmem:[%s4175_s0 + $0x23] sm:$0xff] }
  0x9f   :  { %2878 = vmatmul.mubr.msk.bf16.vlgmr.msra.gmra.mrb[0].mxu1 %vm163_vm1, %v160_v21  ;;  %v421_v32 = vld [vmem:[%s4175_s0 + $0x4] sm:$0xff]  ;;  %v356_v34 = vpack.c.bf16 %v354_v31, %v353_v30  ;;  %v423_v37 = vld [vmem:[%s4175_s0 + $0x1c] sm:$0xff] }
  0xa0   :  { %v425_v35 = vpack.c.bf16 %v422_v33, %v421_v32  ;;  %v424_v38 = vld [vmem:[%s4175_s0 + $0x24] sm:$0xff]  ;;  %2913 = vmatprep.mubr.msk.bf16.mxu1 %vm3471_vm3, %v3470_v41 }
  0xa1   :  { %v426_v39 = vpack.c.bf16 %v424_v38, %v423_v37  ;;  %v3000_v40 = vld [vmem:[%s4180_s5 + $0x20] sm:$0xff]   ;;  %v3001_v43 = vld [vmem:[%s4180_s5 + $0x28] sm:$0xff]   ;;  %v579_v37 = vlaneseq }
  0xa2   :  { %2906 = vmatpush3.bf16.msra.mxu1 %v3000_v40 }
  0xa3   :  { %2907 = vmatprep.subr.bf16.mxu1 %v3470_v41 }
  0xa6   :  { %2890 = vmatmul.mubr.msk.bf16.vlgmr.msra.gmra.mrb[0].mxu0 %vm163_vm1, %v286_v27  ;;  %2908 = vmatpush3.bf16.msra.mxu1 %v3001_v43 }
  0xa7   :  { %2894 = vmatpush3.bf16.msra.mxu0 %v366_v24  ;;  %2895 = vmatprep.mubr.msk.bf16.mxu0 %vm163_vm1, %v355_v28 }
  0xa8   :  { %2981 = vmatprep.subr.msk.bf16.mxu0 %vm170_vm0, %v428_v29  ;;  %2909 = vmatprep.subr.bf16.mxu1 %v3470_v41 }
  0xaa   :  { %2910 = vmatpush3.bf16.msra.mxu1 %v3002_v46 }
  0xab   :  { %2911 = vmatprep.subr.bf16.mxu1 %v3470_v41 }
  0xae   :  { %2912 = vmatpush3.bf16.msra.mxu1 %v3003_v48 }
  0xaf   :  { %2917 = vmatprep.subr.bf16.mxu1 %v3470_v41 }
  0xb2   :  { %2896 = vmatmul.mubr.msk.bf16.vlgmr.msra.gmra.mrb[0].mxu0 %vm163_vm1, %v356_v34 }
  0xb3   :  { %2900 = vmatpush3.bf16.msra.mxu0 %v436_v36  ;;  %2901 = vmatprep.mubr.msk.bf16.mxu0 %vm163_vm1, %v425_v35  ;;  %v3472_v35 = vmov 1983009808  }
  0xb4   :  { %v577_v36 = vunpack.c.l.s4 %v3472_v35 }
  0xb6   :  { %v578_v40 = vunpack.c.0.s8 %v577_v36 }
  0xbe   :  { %2902 = vmatmul.mubr.msk.bf16.vlgmr.msra.gmra.mrb[0].mxu0 %vm163_vm1, %v426_v39  ;;  %v2679_v39 = vld [vmem:[%s4178_s3] ss:$0 sm:$0xff] }
 0x172   :  { %v2879_v42 = vpop.f32.mrb[0].mxu1 }
 0x173   :  { %v208_v44 = vpop.f32.mrb[1].mxu1 }
 0x174   :  { %v2880_v45 = vpop.f32.mrb[2].mxu1 }
 0x175   :  { %v211_v47 = vpop.f32.mrb[3].mxu1 }
 0x191   :  { %v2903_v49 = vpop.f32.mrb[0].mxu0 }
 0x192   :  { %v2961_v50 = vadd.f32 %v2903_v49, %v2879_v42  ;;  %v472_v52 = vpop.f32.mrb[1].mxu0  ;;  %v3774_v42 = vshrl.u32 %v579_v37, 7 }
 0x193   :  { %v2962_v53 = vadd.f32 %v472_v52, %v208_v44  ;;  %v2904_v54 = vpop.f32.mrb[2].mxu0 }
 0x194   :  { %v2963_v55 = vadd.f32 %v2904_v54, %v2880_v45  ;;  %v475_v56 = vpop.f32.mrb[3].mxu0  ;;  %v500_v59 = vadd.f32 %v2961_v50, %v2678_v51  ;;  %v3777_v52 = vsub.s32 %v578_v40, %v3774_v42 }
 0x195   :  { %v498_v57 = vadd.f32 %v2962_v53, %v2678_v51  ;;  %v2964_v58 = vadd.f32 %v475_v56, %v211_v47  ;;  %v2680_v47 = vld [vmem:[#allocation7] ss:$0 sm:$0xff] }
 0x196   :  { %v501_v62 = vadd.f32 %v2963_v55, %v2678_v51  ;;  %v508_v1 = vsel %vm504_vm2, %v500_v59, 0.0 }
 0x197   :  { %v499_v60 = vadd.f32 %v2964_v58, %v2678_v51  ;;  %v505_v61 = vsel %vm504_vm2, %v498_v57, 0.0 }
 0x198   :  { %v510_v3 = vsel %vm504_vm2, %v501_v62, 0.0 }
 0x199   :  { %v506_v63 = vsel %vm504_vm2, %v499_v60, 0.0 }
 0x19a   :  { %v507_v0 = vadd.f32 %v506_v63, %v505_v61 }
 0x19c   :  { %v509_v2 = vadd.f32 %v508_v1, %v507_v0 }
 0x19e   :  { %v511_v4 = vadd.f32 %v510_v3, %v509_v2 }
 0x1a0   :  { %v512_v5 = vrot.slane %v511_v4, 4 }
 0x1a2   :  { %v513_v6 = vadd.f32 %v512_v5, %v511_v4 }
 0x1a4   :  { %v514_v7 = vrot.slane %v513_v6, 2 }
 0x1a6   :  { %v515_v8 = vadd.f32 %v514_v7, %v513_v6 }
 0x1a8   :  { %v516_v9 = vrot.slane %v515_v8, 1 }
 0x1aa   :  { %v517_v10 = vadd.f32 %v516_v9, %v515_v8 }
 0x1ac   :  { %v518_v11 = vmul.f32 0.03125, %v517_v10 }
 0x1ae   :  { %v519_v12 = vsub.f32 %v498_v57, %v518_v11  ;;  %v520_v13 = vsub.f32 %v499_v60, %v518_v11  ;;  %v521_v14 = vsub.f32 %v500_v59, %v518_v11  ;;  %v522_v15 = vsub.f32 %v501_v62, %v518_v11 }
 0x1b0   :  { %v523_v16 = vmul.f32 %v519_v12, %v519_v12  ;;  %v524_v17 = vmul.f32 %v520_v13, %v520_v13  ;;  %v525_v18 = vmul.f32 %v521_v14, %v521_v14  ;;  %v526_v19 = vmul.f32 %v522_v15, %v522_v15 }
 0x1b2   :  { %v527_v20 = vsel %vm504_vm2, %v523_v16, 0.0  ;;  %v528_v21 = vsel %vm504_vm2, %v524_v17, 0.0  ;;  %v530_v23 = vsel %vm504_vm2, %v525_v18, 0.0  ;;  %v532_v25 = vsel %vm504_vm2, %v526_v19, 0.0 }
 0x1b3   :  { %v529_v22 = vadd.f32 %v528_v21, %v527_v20 }
 0x1b5   :  { %v531_v24 = vadd.f32 %v530_v23, %v529_v22 }
 0x1b7   :  { %v533_v26 = vadd.f32 %v532_v25, %v531_v24 }
 0x1b9   :  { %v534_v27 = vrot.slane %v533_v26, 4 }
 0x1bb   :  { %v535_v28 = vadd.f32 %v534_v27, %v533_v26 }
 0x1bd   :  { %v536_v29 = vrot.slane %v535_v28, 2 }
 0x1bf   :  { %v537_v30 = vadd.f32 %v536_v29, %v535_v28 }
 0x1c1   :  { %v538_v31 = vrot.slane %v537_v30, 1 }
 0x1c3   :  { %v539_v32 = vadd.f32 %v538_v31, %v537_v30 }
 0x1c5   :  { %v540_v33 = vmul.f32 0.03125, %v539_v32 }
 0x1c7   :  { %v541_v34 = vadd.f32 1e-05, %v540_v33 }
 0x1c9   :  { %3116 = vrsqrt.f32 %v541_v34 }
 0x1d3   :  { %v3117_v38 = vpop.eup %3116 }
 0x1d4   :  { %v543_v43 = vmul.f32 %v3117_v38, %v519_v12  ;;  %v544_v44 = vmul.f32 %v3117_v38, %v520_v13  ;;  %v545_v45 = vmul.f32 %v3117_v38, %v521_v14  ;;  %v546_v46 = vmul.f32 %v3117_v38, %v522_v15 }
 0x1d5   :  { %v3788_v15 = vsub.s32 0, %v3774_v42 }
 0x1d6   :  { %v553_v48 = vmul.f32 %v2679_v39, %v543_v43  ;;  %v554_v49 = vmul.f32 %v2679_v39, %v544_v44  ;;  %v555_v50 = vmul.f32 %v2679_v39, %v545_v45  ;;  %v556_v51 = vmul.f32 %v2679_v39, %v546_v46 }
 0x1d8   :  { %v563_v53 = vadd.f32 %v2680_v47, %v553_v48  ;;  %v564_v54 = vadd.f32 %v2680_v47, %v554_v49  ;;  %v565_v55 = vadd.f32 %v2680_v47, %v555_v50  ;;  %v566_v56 = vadd.f32 %v2680_v47, %v556_v51 }
 0x1da   :  { %v567_v57 = vmax.f32 %v563_v53, 0.0  ;;  %v568_v58 = vmax.f32 %v564_v54, 0.0  ;;  %v569_v59 = vmax.f32 %v565_v55, 0.0  ;;  %v570_v60 = vmax.f32 %v566_v56, 0.0 }
 0x1dc   :  { %v575_v61 = vcombine.high %v567_v57, %v567_v57  ;;  %v582_v62 = vrot.slane %v567_v57, %v3777_v52  ;;  %v592_v63 = vcombine.high %v568_v58, %v568_v58  ;;  %v599_v0 = vrot.slane %v568_v58, %v3777_v52 }
 0x1dd   :  { %v609_v1 = vcombine.high %v569_v59, %v569_v59  ;;  %v616_v2 = vrot.slane %v569_v59, %v3777_v52  ;;  %v626_v3 = vcombine.high %v570_v60, %v570_v60  ;;  %v633_v6 = vrot.slane %v570_v60, %v3777_v52 }
 0x1de   :  { %v589_v4 = vrot.slane %v575_v61, %v3777_v52  ;;  %v590_v5 = vcombine.high %v582_v62, %v582_v62  ;;  %v606_v10 = vrot.slane %v592_v63, %v3777_v52  ;;  %v607_v12 = vcombine.high %v599_v0, %v599_v0 }
 0x1df   :  { %v623_v7 = vrot.slane %v609_v1, %v3777_v52  ;;  %v624_v8 = vcombine.high %v616_v2, %v616_v2  ;;  %v640_v11 = vrot.slane %v626_v3, %v3777_v52  ;;  %v641_v16 = vcombine.high %v633_v6, %v633_v6 }
 0x1e0   :  { %v591_v9 = vcombine.high %v589_v4, %v589_v4  ;;  %v2682_v14 = vrot.slane %v590_v5, 9  ;;  %v2681_v17 = vrot.slane %v582_v62, 9  ;;  %v2683_v18 = vrot.slane %v589_v4, 9 }
 0x1e1   :  { %v625_v13 = vcombine.high %v623_v7, %v623_v7  ;;  %v2689_v20 = vrot.slane %v616_v2, 9  ;;  %v2690_v21 = vrot.slane %v624_v8, 9  ;;  %v2691_v22 = vrot.slane %v623_v7, 9 }
 0x1e2   :  { %v2684_v19 = vrot.slane %v591_v9, 9  ;;  %v608_v24 = vcombine.high %v606_v10, %v606_v10  ;;  %v642_v25 = vcombine.high %v640_v11, %v640_v11  ;;  %v2685_v26 = vrot.slane %v599_v0, 9 }
 0x1e3   :  { %v2692_v23 = vrot.slane %v625_v13, 9  ;;  %v2686_v27 = vrot.slane %v607_v12, 9  ;;  %v2693_v28 = vrot.slane %v633_v6, 9  ;;  %v708_v29 = vmax.f32 %v590_v5, %v2682_v14 }
 0x1e4   :  { %v2694_v30 = vrot.slane %v641_v16, 9  ;;  %v707_v31 = vmax.f32 %v582_v62, %v2681_v17  ;;  %v709_v32 = vmax.f32 %v589_v4, %v2683_v18  ;;  %v710_v33 = vmax.f32 %v591_v9, %v2684_v19 }
 0x1e5   :  { %v715_v34 = vmax.f32 %v616_v2, %v2689_v20  ;;  %v716_v35 = vmax.f32 %v624_v8, %v2690_v21  ;;  %v717_v36 = vmax.f32 %v623_v7, %v2691_v22  ;;  %v718_v37 = vmax.f32 %v625_v13, %v2692_v23  ;;  %v3004_v22 = vld [vmem:[%s4180_s5] sm:$0xff]  }
 0x1e6   :  { %v2687_v38 = vrot.slane %v606_v10, 9  ;;  %v2688_v39 = vrot.slane %v608_v24, 9  ;;  %v2695_v40 = vrot.slane %v640_v11, 9  ;;  %v2696_v43 = vrot.slane %v642_v25, 9 }
 0x1e7   :  { %v711_v44 = vmax.f32 %v599_v0, %v2685_v26  ;;  %v712_v45 = vmax.f32 %v607_v12, %v2686_v27  ;;  %v719_v46 = vmax.f32 %v633_v6, %v2693_v28  ;;  %v750_v47 = vrot.slane %v708_v29, %v3788_v15  ;;  %v3007_v26 = vld [vmem:[%s4180_s5 + $0x18] sm:$0xff]   ;;  %v3008_v29 = vld [vmem:[%s4180_s5 + $0x40] sm:$0xff]  }
 0x1e8   :  { %v720_v48 = vmax.f32 %v641_v16, %v2694_v30  ;;  %v746_v49 = vrot.slane %v707_v31, %v3788_v15  ;;  %v754_v50 = vrot.slane %v709_v32, %v3788_v15  ;;  %v758_v51 = vrot.slane %v710_v33, %v3788_v15  ;;  %v3009_v31 = vld [vmem:[%s4180_s5 + $0x48] sm:$0xff]   ;;  %v3010_v32 = vld [vmem:[%s4180_s5 + $0x50] sm:$0xff]   ;;  %v3011_v33 = vld [vmem:[%s4180_s5 + $0x58] sm:$0xff]  }
 0x1e9   :  { %v778_v53 = vrot.slane %v715_v34, %v3788_v15  ;;  %v782_v54 = vrot.slane %v716_v35, %v3788_v15  ;;  %v786_v55 = vrot.slane %v717_v36, %v3788_v15  ;;  %v790_v56 = vrot.slane %v718_v37, %v3788_v15  ;;  %v3014_v37 = vld [vmem:[#allocation13 + $0x4] ss:$16 sps:$4 sm:$0xff]  }
 0x1ea   :  { %v713_v57 = vmax.f32 %v606_v10, %v2687_v38  ;;  %v721_v58 = vmax.f32 %v640_v11, %v2695_v40  ;;  %v714_v59 = vmax.f32 %v608_v24, %v2688_v39  ;;  %v722_v60 = vmax.f32 %v642_v25, %v2696_v43  ;;  %v3005_v24 = vld [vmem:[%s4180_s5 + $0x8] sm:$0xff]   ;;  %v3006_v25 = vld [vmem:[%s4180_s5 + $0x10] sm:$0xff]   ;;  %1456 = vmatprep.subr.bf16.mxu0 %v3014_v37 }
 0x1eb   :  { %v808_v61 = vsel %vm807_vm4, %v750_v47, %v746_v49  ;;  %v821_v62 = vsel %vm807_vm4, %v782_v54, %v778_v53  ;;  %v762_v63 = vrot.slane %v711_v44, %v3788_v15  ;;  %v794_v0 = vrot.slane %v719_v46, %v3788_v15  ;;  %v3017_v38 = vld [vmem:[#allocation13 + $0xc] ss:$16 sps:$4 sm:$0xff]   ;;  %v3012_v39 = vld [vmem:[#allocation13] ss:$16 sps:$4 sm:$0xff]   ;;  %v3015_v40 = vld [vmem:[#allocation13 + $0x8] ss:$16 sps:$4 sm:$0xff]  }
 0x1ec   :  { %v810_v1 = vsel %vm809_vm5, %v754_v50, %v808_v61  ;;  %v822_v2 = vsel %vm809_vm5, %v786_v55, %v821_v62  ;;  %v766_v3 = vrot.slane %v712_v45, %v3788_v15  ;;  %v798_v4 = vrot.slane %v720_v48, %v3788_v15  ;;  %1457 = vmatpush1.bf16.msra.mxu0 %v3012_v39  ;;  %v3020_v43 = vld [vmem:[#allocation13 + $0x24] ss:$16 sps:$4 sm:$0xff]   ;;  %v3023_v44 = vld [vmem:[#allocation13 + $0x2c] ss:$16 sps:$4 sm:$0xff]   ;;  %v3018_v45 = vld [vmem:[#allocation13 + $0x20] ss:$16 sps:$4 sm:$0xff]  }
 0x1ed   :  { %v812_v5 = vsel %vm811_vm6, %v758_v51, %v810_v1  ;;  %v823_v6 = vsel %vm811_vm6, %v790_v56, %v822_v2  ;;  %v770_v7 = vrot.slane %v713_v57, %v3788_v15  ;;  %v802_v8 = vrot.slane %v721_v58, %v3788_v15  ;;  %v3021_v46 = vld [vmem:[#allocation13 + $0x28] ss:$16 sps:$4 sm:$0xff]   ;;  %1458 = vmatprep.subr.bf16.mxu0 %v3020_v43  ;;  %v3026_v47 = vld [vmem:[#allocation13 + $0x44] ss:$16 sps:$4 sm:$0xff]   ;;  %v3029_v48 = vld [vmem:[#allocation13 + $0x4c] ss:$16 sps:$4 sm:$0xff]  }
 0x1ee   :  { %v814_v9 = vsel %vm813_vm7, %v762_v63, %v812_v5  ;;  %v824_v10 = vsel %vm813_vm7, %v794_v0, %v823_v6  ;;  %v774_v11 = vrot.slane %v714_v59, %v3788_v15  ;;  %v806_v12 = vrot.slane %v722_v60, %v3788_v15  ;;  %v3024_v49 = vld [vmem:[#allocation13 + $0x40] ss:$16 sps:$4 sm:$0xff]   ;;  %v3027_v50 = vld [vmem:[#allocation13 + $0x48] ss:$16 sps:$4 sm:$0xff]   ;;  %v3032_v51 = vld [vmem:[#allocation13 + $0x64] ss:$16 sps:$4 sm:$0xff]  }
 0x1ef   :  { %v816_v13 = vsel %vm815_vm8, %v766_v3, %v814_v9  ;;  %v825_v14 = vsel %vm815_vm8, %v798_v4, %v824_v10  ;;  %v3035_v53 = vld [vmem:[#allocation13 + $0x6c] ss:$16 sps:$4 sm:$0xff]   ;;  %v3030_v54 = vld [vmem:[#allocation13 + $0x60] ss:$16 sps:$4 sm:$0xff]   ;;  %v3033_v55 = vld [vmem:[#allocation13 + $0x68] ss:$16 sps:$4 sm:$0xff]  }
 0x1f0   :  { %v818_v16 = vsel %vm817_vm9, %v770_v7, %v816_v13  ;;  %v826_v17 = vsel %vm817_vm9, %v802_v8, %v825_v14  ;;  %1459 = vmatpush1.bf16.msra.mxu0 %v3018_v45  ;;  %v3038_v56 = vld [vmem:[#allocation13 + $0x84] ss:$16 sps:$4 sm:$0xff]   ;;  %v3041_v57 = vld [vmem:[#allocation13 + $0x8c] ss:$16 sps:$4 sm:$0xff]   ;;  %v3036_v58 = vld [vmem:[#allocation13 + $0x80] ss:$16 sps:$4 sm:$0xff]  }
 0x1f1   :  { %v820_v18 = vsel %vm819_vm10, %v774_v11, %v818_v16  ;;  %v827_v19 = vsel %vm819_vm10, %v806_v12, %v826_v17  ;;  %1460 = vmatprep.subr.bf16.mxu0 %v3026_v47  ;;  %v3039_v59 = vld [vmem:[#allocation13 + $0x88] ss:$16 sps:$4 sm:$0xff]   ;;  %v3044_v60 = vld [vmem:[#allocation13 + $0xa4] ss:$16 sps:$4 sm:$0xff]   ;;  %v3047_v61 = vld [vmem:[#allocation13 + $0xac] ss:$16 sps:$4 sm:$0xff]  }
 0x1f2   :  { %830 = vst.msk [vmem:[#allocation2 + $0x8] sm:$0xff] %vm504_vm2, %v820_v18  ;;  %831 = vst.msk [vmem:[#allocation2 + $0x20] sm:$0xff] %vm504_vm2, %v827_v19  ;;  %v3042_v62 = vld [vmem:[#allocation13 + $0xa0] ss:$16 sps:$4 sm:$0xff]   ;;  %v3045_v63 = vld [vmem:[#allocation13 + $0xa8] ss:$16 sps:$4 sm:$0xff]  }
 0x1f3   :  { %v3050_v0 = vld [vmem:[#allocation13 + $0xc4] ss:$16 sps:$4 sm:$0xff]   ;;  %v3048_v1 = vld [vmem:[#allocation13 + $0xc0] ss:$16 sps:$4 sm:$0xff]   ;;  %v3051_v2 = vld [vmem:[#allocation13 + $0xc8] ss:$16 sps:$4 sm:$0xff]  }
 0x1f4   :  { %1461 = vmatpush1.bf16.msra.mxu0 %v3024_v49  ;;  %v3053_v3 = vld [vmem:[#allocation13 + $0xcc] ss:$16 sps:$4 sm:$0xff]   ;;  %v3056_v4 = vld [vmem:[#allocation13 + $0xe4] ss:$16 sps:$4 sm:$0xff]   ;;  %v3473_v6 = vmov 0  }
 0x1f5   :  { %1462 = vmatprep.subr.bf16.mxu0 %v3032_v51  ;;  %v3059_v5 = vld [vmem:[#allocation13 + $0xec] ss:$16 sps:$4 sm:$0xff]   ;;  %1488 = vmatprep.mubr.bf16.mxu0 %v3473_v6  ;;  %v3054_v7 = vld [vmem:[#allocation13 + $0xe0] ss:$16 sps:$4 sm:$0xff]   ;;  %v3057_v8 = vld [vmem:[#allocation13 + $0xe8] ss:$16 sps:$4 sm:$0xff]  }
 0x1f6   :  { %v3862_v9 = vld [vmem:[#allocation15 + $0x4] ss:$16 sps:$4 sm:$0xff]   ;;  %v3864_v10 = vld [vmem:[#allocation15 + $0xc] ss:$16 sps:$4 sm:$0xff]  }
 0x1f8   :  { %1463 = vmatpush1.bf16.msra.mxu0 %v3030_v54 }
 0x1f9   :  { %v843_v20 = vld [vmem:[#allocation2 + $0x8] sm:$0xff]  ;;  %v844_v21 = vld [vmem:[#allocation2 + $0x20] sm:$0xff]  ;;  %1464 = vmatprep.subr.bf16.mxu0 %v3038_v56 }
 0x1fa   :  { %v845_v23 = vpack.c.bf16 %v844_v21, %v843_v20  ;;  %v832_v27 = vld [vmem:[#allocation2 + $0x7] sm:$0xff]  ;;  %v833_v28 = vld [vmem:[#allocation2 + $0x1f] sm:$0xff] }
 0x1fb   :  { %v834_v30 = vpack.c.bf16 %v833_v28, %v832_v27  ;;  %v991_v34 = vld [vmem:[#allocation2 + $0x9] sm:$0xff]  ;;  %v992_v35 = vld [vmem:[#allocation2 + $0x21] sm:$0xff] }
 0x1fc   :  { %2914 = vmatmul.mubr.msk.bf16.vlgmr.msra.gmra.mrb[4].mxu1 %vm504_vm2, %v845_v23  ;;  %v993_v36 = vpack.c.bf16 %v992_v35, %v991_v34  ;;  %1465 = vmatpush1.bf16.msra.mxu0 %v3036_v58  ;;  %v2729_v56 = vld [vmem:[#allocation10] ss:$0 sm:$0xff] }
 0x1fd   :  { %2918 = vmatpush3.bf16.msra.mxu1 %v3004_v22  ;;  %2925 = vmatprep.mubr.msk.bf16.mxu1 %vm3471_vm3, %v3470_v41 }
 0x1fe   :  { %2919 = vmatprep.subr.bf16.mxu1 %v3470_v41  ;;  %1466 = vmatprep.subr.bf16.mxu0 %v3044_v60 }
 0x200   :  { %1467 = vmatpush1.bf16.msra.mxu0 %v3042_v62 }
 0x201   :  { %2920 = vmatpush3.bf16.msra.mxu1 %v3005_v24  ;;  %1468 = vmatprep.subr.bf16.mxu0 %v3050_v0 }
 0x202   :  { %2921 = vmatprep.subr.bf16.mxu1 %v3470_v41 }
 0x204   :  { %1469 = vmatpush1.bf16.msra.mxu0 %v3048_v1 }
 0x205   :  { %2922 = vmatpush3.bf16.msra.mxu1 %v3006_v25  ;;  %1470 = vmatprep.subr.bf16.mxu0 %v3056_v4  ;;  %v2728_v25 = vld [vmem:[#allocation9] ss:$0 sm:$0xff] }
 0x206   :  { %2923 = vmatprep.subr.bf16.mxu1 %v3470_v41 }
 0x208   :  { %1471 = vmatpush1.bf16.msra.mxu0 %v3054_v7 }
 0x209   :  { %2924 = vmatpush3.bf16.msra.mxu1 %v3007_v26  ;;  %1749 = vmatprep.subr.bf16.mxu0 %v3862_v9 }
 0x20a   :  { %2929 = vmatprep.subr.bf16.mxu1 %v3470_v41 }
 0x20c   :  { %2926 = vmatmul.mubr.msk.bf16.vlgmr.msra.gmra.mrb[8].mxu1 %vm504_vm2, %v834_v30 }
 0x20d   :  { %2930 = vmatpush3.bf16.msra.mxu1 %v3008_v29  ;;  %2937 = vmatprep.mubr.msk.bf16.mxu1 %vm3471_vm3, %v3470_v41 }
 0x20e   :  { %2931 = vmatprep.subr.bf16.mxu1 %v3470_v41 }
 0x211   :  { %2932 = vmatpush3.bf16.msra.mxu1 %v3009_v31 }
 0x212   :  { %2933 = vmatprep.subr.bf16.mxu1 %v3470_v41 }
 0x215   :  { %2934 = vmatpush3.bf16.msra.mxu1 %v3010_v32 }
 0x216   :  { %2935 = vmatprep.subr.bf16.mxu1 %v3470_v41 }
 0x219   :  { %2936 = vmatpush3.bf16.msra.mxu1 %v3011_v33 }
 0x21a   :  { %1497 = vmatprep.subr.bf16.mxu1 %v3017_v38 }
 0x21c   :  { %2938 = vmatmul.mubr.msk.bf16.vlgmr.msra.gmra.mrb[12].mxu1 %vm504_vm2, %v993_v36 }
 0x21d   :  { %1498 = vmatpush1.bf16.msra.mxu1 %v3015_v40  ;;  %1529 = vmatprep.mubr.bf16.mxu1 %v3473_v6 }
 0x21e   :  { %1499 = vmatprep.subr.bf16.mxu1 %v3023_v44 }
 0x221   :  { %1500 = vmatpush1.bf16.msra.mxu1 %v3021_v46 }
 0x222   :  { %1501 = vmatprep.subr.bf16.mxu1 %v3029_v48 }
 0x225   :  { %1502 = vmatpush1.bf16.msra.mxu1 %v3027_v50 }
 0x226   :  { %1503 = vmatprep.subr.bf16.mxu1 %v3035_v53 }
 0x229   :  { %1504 = vmatpush1.bf16.msra.mxu1 %v3033_v55 }
 0x22a   :  { %1505 = vmatprep.subr.bf16.mxu1 %v3041_v57 }
 0x22d   :  { %1506 = vmatpush1.bf16.msra.mxu1 %v3039_v59  ;;  %v2730_v59 = vld [vmem:[#allocation12] ss:$0 sm:$0xff] }
 0x22e   :  { %1507 = vmatprep.subr.bf16.mxu1 %v3047_v61 }
 0x231   :  { %1508 = vmatpush1.bf16.msra.mxu1 %v3045_v63 }
 0x232   :  { %1509 = vmatprep.subr.bf16.mxu1 %v3053_v3 }
 0x235   :  { %1510 = vmatpush1.bf16.msra.mxu1 %v3051_v2 }
 0x236   :  { %1511 = vmatprep.subr.bf16.mxu1 %v3059_v5 }
 0x239   :  { %1512 = vmatpush1.bf16.msra.mxu1 %v3057_v8 }
 0x23a   :  { %1790 = vmatprep.subr.bf16.mxu1 %v3864_v10 }
 0x2cf   :  { %v916_v11 = vpop.f32.mrb[4].mxu1 }
 0x2d0   :  { %v2915_v12 = vpop.f32.mrb[5].mxu1 }
 0x2d1   :  { %v919_v13 = vpop.f32.mrb[6].mxu1 }
 0x2d2   :  { %v2916_v14 = vpop.f32.mrb[7].mxu1 }
 0x2df   :  { %v984_v16 = vpop.f32.mrb[8].mxu1 }
 0x2e0   :  { %v985_v17 = vadd.f32 %v984_v16, %v916_v11  ;;  %v2927_v18 = vpop.f32.mrb[9].mxu1 }
 0x2e1   :  { %v987_v19 = vpop.f32.mrb[10].mxu1 }
 0x2e2   :  { %v988_v20 = vadd.f32 %v987_v19, %v919_v13  ;;  %v2928_v21 = vpop.f32.mrb[11].mxu1 }
 0x2ef   :  { %v1064_v22 = vpop.f32.mrb[12].mxu1 }
 0x2f0   :  { %v1071_v23 = vadd.f32 %v1064_v22, %v985_v17  ;;  %v2939_v24 = vpop.f32.mrb[13].mxu1 }
 0x2f1   :  { %v1067_v26 = vpop.f32.mrb[14].mxu1 }
 0x2f2   :  { %v1072_v27 = vadd.f32 %v1067_v26, %v988_v20  ;;  %v2940_v28 = vpop.f32.mrb[15].mxu1  ;;  %v1080_v29 = vadd.f32 %v2728_v25, %v1071_v23 }
 0x2f4   :  { %v1081_v30 = vadd.f32 %v2728_v25, %v1072_v27 }
 0x2f6   :  { %v1084_v31 = vadd.f32 %v1081_v30, %v1080_v29 }
 0x2f8   :  { %v1085_v32 = vrot.slane %v1084_v31, 4 }
 0x2fa   :  { %v1086_v33 = vadd.f32 %v1085_v32, %v1084_v31 }
 0x2fc   :  { %v1087_v34 = vrot.slane %v1086_v33, 2 }
 0x2fe   :  { %v1088_v35 = vadd.f32 %v1087_v34, %v1086_v33 }
 0x300   :  { %v1089_v36 = vrot.slane %v1088_v35, 1 }
 0x302   :  { %v1090_v37 = vadd.f32 %v1089_v36, %v1088_v35 }
 0x304   :  { %v1091_v38 = vmul.f32 0.0625, %v1090_v37 }
 0x306   :  { %v1092_v39 = vsub.f32 %v1080_v29, %v1091_v38  ;;  %v1093_v40 = vsub.f32 %v1081_v30, %v1091_v38 }
 0x308   :  { %v1094_v43 = vmul.f32 %v1092_v39, %v1092_v39  ;;  %v1095_v44 = vmul.f32 %v1093_v40, %v1093_v40 }
 0x30a   :  { %v1096_v45 = vadd.f32 %v1095_v44, %v1094_v43 }
 0x30c   :  { %v1097_v46 = vrot.slane %v1096_v45, 4 }
 0x30e   :  { %v1098_v47 = vadd.f32 %v1097_v46, %v1096_v45 }
 0x310   :  { %v1099_v48 = vrot.slane %v1098_v47, 2 }
 0x312   :  { %v1100_v49 = vadd.f32 %v1099_v48, %v1098_v47 }
 0x314   :  { %v1101_v50 = vrot.slane %v1100_v49, 1 }
 0x316   :  { %v1102_v51 = vadd.f32 %v1101_v50, %v1100_v49 }
 0x318   :  { %v1103_v53 = vmul.f32 0.0625, %v1102_v51 }
 0x31a   :  { %v1104_v54 = vadd.f32 1e-05, %v1103_v53 }
 0x31c   :  { %3118 = vrsqrt.f32 %v1104_v54 }
 0x326   :  { %v3119_v55 = vpop.eup %3118 }
 0x327   :  { %v1106_v57 = vmul.f32 %v3119_v55, %v1092_v39  ;;  %v1107_v58 = vmul.f32 %v3119_v55, %v1093_v40 }
 0x329   :  { %v1114_v60 = vmul.f32 %v2729_v56, %v1106_v57  ;;  %v1115_v61 = vmul.f32 %v2729_v56, %v1107_v58 }
 0x32b   :  { %v1122_v62 = vadd.f32 %v2730_v59, %v1114_v60  ;;  %v1123_v63 = vadd.f32 %v2730_v59, %v1115_v61 }
 0x32d   :  { %v1124_v0 = vmax.f32 %v1122_v62, 0.0  ;;  %v1125_v1 = vmax.f32 %v1123_v63, 0.0 }
 0x32f   :  { %v1128_v2 = vcombine.high %v1124_v0, %v1124_v0  ;;  %v1135_v3 = vrot.slane %v1124_v0, %v3777_v52  ;;  %v1145_v4 = vcombine.high %v1125_v1, %v1125_v1  ;;  %v1152_v5 = vrot.slane %v1125_v1, %v3777_v52  ;;  %v3879_v0 = vld [vmem:[#allocation15] ss:$16 sps:$4 sm:$0xff]   ;;  %v3881_v1 = vld [vmem:[#allocation15 + $0x8] ss:$16 sps:$4 sm:$0xff]  }
 0x331   :  { %v1142_v7 = vrot.slane %v1128_v2, %v3777_v52  ;;  %v1143_v8 = vcombine.high %v1135_v3, %v1135_v3  ;;  %v1159_v11 = vrot.slane %v1145_v4, %v3777_v52  ;;  %v1160_v12 = vcombine.high %v1152_v5, %v1152_v5  ;;  %v3885_v4 = vld [vmem:[#allocation15 + $0x2c] ss:$16 sps:$4 sm:$0xff]  }
 0x332   :  { %v2731_v13 = vrot.slane %v1135_v3, 9  ;;  %v2735_v14 = vrot.slane %v1152_v5, 9 }
 0x333   :  { %v1144_v16 = vcombine.high %v1142_v7, %v1142_v7  ;;  %v2732_v17 = vrot.slane %v1143_v8, 9  ;;  %v2733_v18 = vrot.slane %v1142_v7, 9  ;;  %v2736_v19 = vrot.slane %v1160_v12, 9 }
 0x334   :  { %v1194_v20 = vmax.f32 %v1135_v3, %v2731_v13  ;;  %v1198_v21 = vmax.f32 %v1152_v5, %v2735_v14  ;;  %v1161_v22 = vcombine.high %v1159_v11, %v1159_v11  ;;  %v2737_v23 = vrot.slane %v1159_v11, 9  ;;  %v3883_v3 = vld [vmem:[#allocation15 + $0x24] ss:$16 sps:$4 sm:$0xff]   ;;  %v3889_v5 = vld [vmem:[#allocation15 + $0x20] ss:$16 sps:$4 sm:$0xff]  }
 0x335   :  { %v2734_v24 = vrot.slane %v1144_v16, 9  ;;  %v1195_v25 = vmax.f32 %v1143_v8, %v2732_v17  ;;  %v1196_v26 = vmax.f32 %v1142_v7, %v2733_v18  ;;  %v1199_v27 = vmax.f32 %v1160_v12, %v2736_v19  ;;  %v3891_v7 = vld [vmem:[#allocation15 + $0x28] ss:$16 sps:$4 sm:$0xff]   ;;  %v3895_v8 = vld [vmem:[#allocation15 + $0x44] ss:$16 sps:$4 sm:$0xff]  }
 0x336   :  { %v1202_v28 = vpack.c.bf16 %v1194_v20, %v1194_v20  ;;  %v1206_v29 = vpack.c.bf16 %v1198_v21, %v1198_v21  ;;  %v2738_v30 = vrot.slane %v1161_v22, 9  ;;  %v1200_v31 = vmax.f32 %v1159_v11, %v2737_v23  ;;  %v3897_v11 = vld [vmem:[#allocation15 + $0x4c] ss:$16 sps:$4 sm:$0xff]   ;;  %v3903_v12 = vld [vmem:[#allocation15 + $0x40] ss:$16 sps:$4 sm:$0xff]  }
 0x337   :  { %v1203_v52 = vpack.c.bf16 %v1195_v25, %v1195_v25  ;;  %v1204_v32 = vpack.c.bf16 %v1196_v26, %v1196_v26  ;;  %v1197_v33 = vmax.f32 %v1144_v16, %v2734_v24  ;;  %v1207_v34 = vpack.c.bf16 %v1199_v27, %v1199_v27  ;;  %v3905_v13 = vld [vmem:[#allocation15 + $0x48] ss:$16 sps:$4 sm:$0xff]   ;;  %v3909_v14 = vld [vmem:[#allocation15 + $0x64] ss:$16 sps:$4 sm:$0xff]   ;;  %v3911_v16 = vld [vmem:[#allocation15 + $0x6c] ss:$16 sps:$4 sm:$0xff]  }
 0x338   :  { %v1201_v35 = vmax.f32 %v1161_v22, %v2738_v30  ;;  %v1208_v36 = vpack.c.bf16 %v1200_v31, %v1200_v31  ;;  %v1272_v40 = vunpack.c.l.b16 %v1202_v28  ;;  %v1276_v43 = vunpack.c.l.b16 %v1206_v29  ;;  %v3915_v17 = vld [vmem:[#allocation15 + $0x60] ss:$16 sps:$4 sm:$0xff]   ;;  %v3917_v18 = vld [vmem:[#allocation15 + $0x68] ss:$16 sps:$4 sm:$0xff]   ;;  %v3921_v19 = vld [vmem:[#allocation15 + $0x84] ss:$16 sps:$4 sm:$0xff]  }
 0x339   :  { %v1273_v37 = vunpack.c.l.b16 %v1203_v52  ;;  %v1274_v38 = vunpack.c.l.b16 %v1204_v32  ;;  %v1205_v39 = vpack.c.bf16 %v1197_v33, %v1197_v33  ;;  %v1277_v48 = vunpack.c.l.b16 %v1207_v34  ;;  %v3923_v20 = vld [vmem:[#allocation15 + $0x8c] ss:$16 sps:$4 sm:$0xff]   ;;  %v3927_v21 = vld [vmem:[#allocation15 + $0x80] ss:$16 sps:$4 sm:$0xff]   ;;  %v3929_v22 = vld [vmem:[#allocation15 + $0x88] ss:$16 sps:$4 sm:$0xff]  }
 0x33a   :  { %v1209_v44 = vpack.c.bf16 %v1201_v35, %v1201_v35  ;;  %v1278_v49 = vunpack.c.l.b16 %v1208_v36  ;;  %v1286_v55 = vrot.slane %v1276_v43, 4  ;;  %v3933_v23 = vld [vmem:[#allocation15 + $0xa4] ss:$16 sps:$4 sm:$0xff]   ;;  %v3935_v24 = vld [vmem:[#allocation15 + $0xac] ss:$16 sps:$4 sm:$0xff]   ;;  %v1254_v34 = vsub.s32 2, %v3774_v42 }
 0x33b   :  { %v1280_v45 = vrot.slane %v1273_v37, 7  ;;  %v1282_v46 = vrot.slane %v1274_v38, 6  ;;  %v1275_v47 = vunpack.c.l.b16 %v1205_v39  ;;  %v1288_v57 = vrot.slane %v1277_v48, 3  ;;  %v3939_v25 = vld [vmem:[#allocation15 + $0xa0] ss:$16 sps:$4 sm:$0xff]  }
 0x33c   :  { %v1279_v50 = vunpack.c.l.b16 %v1209_v44  ;;  %v1290_v59 = vrot.slane %v1278_v49, 2  ;;  %v3941_v26 = vld [vmem:[#allocation15 + $0xa8] ss:$16 sps:$4 sm:$0xff]   ;;  %v3945_v27 = vld [vmem:[#allocation15 + $0xc4] ss:$16 sps:$4 sm:$0xff]   ;;  %v1250_v36 = vsub.s32 1, %v3774_v42 }
 0x33d   :  { %v1281_v51 = vsel %vm807_vm4, %v1280_v45, %v1272_v40  ;;  %v1284_v53 = vrot.slane %v1275_v47, 5  ;;  %v3947_v28 = vld [vmem:[#allocation15 + $0xcc] ss:$16 sps:$4 sm:$0xff]   ;;  %v3951_v29 = vld [vmem:[#allocation15 + $0xc0] ss:$16 sps:$4 sm:$0xff]   ;;  %v1258_v37 = vsub.s32 3, %v3774_v42 }
 0x33e   :  { %v1283_v54 = vsel %vm809_vm5, %v1282_v46, %v1281_v51  ;;  %v1292_v61 = vrot.slane %v1279_v50, 1  ;;  %v3953_v30 = vld [vmem:[#allocation15 + $0xc8] ss:$16 sps:$4 sm:$0xff]   ;;  %v3957_v31 = vld [vmem:[#allocation15 + $0xe4] ss:$16 sps:$4 sm:$0xff]  }
 0x33f   :  { %v1285_v56 = vsel %vm811_vm6, %v1284_v53, %v1283_v54  ;;  %v3959_v52 = vld [vmem:[#allocation15 + $0xec] ss:$16 sps:$4 sm:$0xff]   ;;  %v3963_v32 = vld [vmem:[#allocation15 + $0xe0] ss:$16 sps:$4 sm:$0xff]   ;;  %v3965_v33 = vld [vmem:[#allocation15 + $0xe8] ss:$16 sps:$4 sm:$0xff]  }
 0x340   :  { %v1287_v58 = vsel %vm813_vm7, %v1286_v55, %v1285_v56  ;;  %v1242_v35 = vld [vmem:[%s4186_s11] sm:$0xf] }
 0x341   :  { %v1289_v60 = vsel %vm815_vm8, %v1288_v57, %v1287_v58  ;;  %v1247_v38 = vrot.slane %v1242_v35, %v3788_v15  ;;  %v1255_v39 = vrot.slane %v1242_v35, %v1254_v34  ;;  %v1251_v40 = vrot.slane %v1242_v35, %v1250_v36 }
 0x342   :  { %v1291_v62 = vsel %vm817_vm9, %v1290_v59, %v1289_v60  ;;  %v1259_v43 = vrot.slane %v1242_v35, %v1258_v37  ;;  %v3474_v15 = vmov 1966171168  }
 0x343   :  { %v1293_v63 = vsel %vm819_vm10, %v1292_v61, %v1291_v62  ;;  %v1838_v61 = vunpack.c.l.s4 %v3474_v15 }
 0x344   :  { %v1294_v2 = vpack.c.b16 %v1293_v63, %v1293_v63 }
 0x345   :  { %v1839_v62 = vunpack.c.0.s8 %v1838_v61 }
 0x346   :  { %1489 = vmatmul.mubr.bf16.vlgmr.msra.gmra.mrb[4].mxu0 %v1294_v2  ;;  %1530 = vmatmul.mubr.bf16.vlgmr.msra.gmra.mrb[16].mxu1 %v1294_v2 }
 0x347   :  { %1750 = vmatpush1.bf16.msra.mxu0 %v3879_v0  ;;  %1791 = vmatpush1.bf16.msra.mxu1 %v3881_v1  ;;  %v4017_v63 = vsub.s32 %v1839_v62, %v3774_v42 }
 0x348   :  { %1751 = vmatprep.subr.bf16.mxu0 %v3883_v3  ;;  %1792 = vmatprep.subr.bf16.mxu1 %v3885_v4 }
 0x349   :  { %1781 = vmatprep.mubr.bf16.mxu0 %v3473_v6  ;;  %1822 = vmatprep.mubr.bf16.mxu1 %v3473_v6 }
 0x34b   :  { %1752 = vmatpush1.bf16.msra.mxu0 %v3889_v5  ;;  %1793 = vmatpush1.bf16.msra.mxu1 %v3891_v7 }
 0x34c   :  { %1753 = vmatprep.subr.bf16.mxu0 %v3895_v8  ;;  %1794 = vmatprep.subr.bf16.mxu1 %v3897_v11 }
 0x34f   :  { %1754 = vmatpush1.bf16.msra.mxu0 %v3903_v12  ;;  %1795 = vmatpush1.bf16.msra.mxu1 %v3905_v13 }
 0x350   :  { %1755 = vmatprep.subr.bf16.mxu0 %v3909_v14  ;;  %1796 = vmatprep.subr.bf16.mxu1 %v3911_v16 }
 0x353   :  { %1756 = vmatpush1.bf16.msra.mxu0 %v3915_v17  ;;  %1797 = vmatpush1.bf16.msra.mxu1 %v3917_v18 }
 0x354   :  { %1757 = vmatprep.subr.bf16.mxu0 %v3921_v19  ;;  %1798 = vmatprep.subr.bf16.mxu1 %v3923_v20 }
 0x357   :  { %1758 = vmatpush1.bf16.msra.mxu0 %v3927_v21  ;;  %1799 = vmatpush1.bf16.msra.mxu1 %v3929_v22 }
 0x358   :  { %1759 = vmatprep.subr.bf16.mxu0 %v3933_v23  ;;  %1800 = vmatprep.subr.bf16.mxu1 %v3935_v24 }
 0x35b   :  { %1760 = vmatpush1.bf16.msra.mxu0 %v3939_v25  ;;  %1801 = vmatpush1.bf16.msra.mxu1 %v3941_v26 }
 0x35c   :  { %1761 = vmatprep.subr.bf16.mxu0 %v3945_v27  ;;  %1802 = vmatprep.subr.bf16.mxu1 %v3947_v28 }
 0x35f   :  { %1762 = vmatpush1.bf16.msra.mxu0 %v3951_v29  ;;  %1803 = vmatpush1.bf16.msra.mxu1 %v3953_v30 }
 0x360   :  { %1763 = vmatprep.subr.bf16.mxu0 %v3957_v31  ;;  %1804 = vmatprep.subr.bf16.mxu1 %v3959_v52 }
 0x363   :  { %1764 = vmatpush1.bf16.msra.mxu0 %v3963_v32  ;;  %1805 = vmatpush1.bf16.msra.mxu1 %v3965_v33 }
 0x364   :  { %1947 = vmatprep.subr.bf16.mxu0 %v3862_v9  ;;  %1988 = vmatprep.subr.bf16.mxu1 %v3864_v10 }
 0x366   :  { %1782 = vmatmul.mubr.bf16.vlgmr.msra.gmra.mrb[8].mxu0 %v3473_v6  ;;  %1823 = vmatmul.mubr.bf16.vlgmr.msra.gmra.mrb[20].mxu1 %v3473_v6 }
 0x367   :  { %1948 = vmatpush1.bf16.msra.mxu0 %v3879_v0  ;;  %1989 = vmatpush1.bf16.msra.mxu1 %v3881_v1 }
 0x368   :  { %1949 = vmatprep.subr.bf16.mxu0 %v3883_v3  ;;  %1990 = vmatprep.subr.bf16.mxu1 %v3885_v4 }
 0x369   :  { %1979 = vmatprep.mubr.bf16.mxu0 %v3473_v6  ;;  %2020 = vmatprep.mubr.bf16.mxu1 %v3473_v6 }
 0x36b   :  { %1950 = vmatpush1.bf16.msra.mxu0 %v3889_v5  ;;  %1991 = vmatpush1.bf16.msra.mxu1 %v3891_v7 }
 0x36c   :  { %1951 = vmatprep.subr.bf16.mxu0 %v3895_v8  ;;  %1992 = vmatprep.subr.bf16.mxu1 %v3897_v11 }
 0x36f   :  { %1952 = vmatpush1.bf16.msra.mxu0 %v3903_v12  ;;  %1993 = vmatpush1.bf16.msra.mxu1 %v3905_v13 }
 0x370   :  { %1953 = vmatprep.subr.bf16.mxu0 %v3909_v14  ;;  %1994 = vmatprep.subr.bf16.mxu1 %v3911_v16 }
 0x373   :  { %1954 = vmatpush1.bf16.msra.mxu0 %v3915_v17  ;;  %1995 = vmatpush1.bf16.msra.mxu1 %v3917_v18 }
 0x374   :  { %1955 = vmatprep.subr.bf16.mxu0 %v3921_v19  ;;  %1996 = vmatprep.subr.bf16.mxu1 %v3923_v20 }
 0x377   :  { %1956 = vmatpush1.bf16.msra.mxu0 %v3927_v21  ;;  %1997 = vmatpush1.bf16.msra.mxu1 %v3929_v22 }
 0x378   :  { %1957 = vmatprep.subr.bf16.mxu0 %v3933_v23  ;;  %1998 = vmatprep.subr.bf16.mxu1 %v3935_v24 }
 0x37b   :  { %1958 = vmatpush1.bf16.msra.mxu0 %v3939_v25  ;;  %1999 = vmatpush1.bf16.msra.mxu1 %v3941_v26 }
 0x37c   :  { %1959 = vmatprep.subr.bf16.mxu0 %v3945_v27  ;;  %2000 = vmatprep.subr.bf16.mxu1 %v3947_v28 }
 0x37f   :  { %1960 = vmatpush1.bf16.msra.mxu0 %v3951_v29  ;;  %2001 = vmatpush1.bf16.msra.mxu1 %v3953_v30 }
 0x380   :  { %1961 = vmatprep.subr.bf16.mxu0 %v3957_v31  ;;  %2002 = vmatprep.subr.bf16.mxu1 %v3959_v52 }
 0x383   :  { %1962 = vmatpush1.bf16.msra.mxu0 %v3963_v32  ;;  %2003 = vmatpush1.bf16.msra.mxu1 %v3965_v33 }
 0x384   :  { %2145 = vmatprep.subr.bf16.mxu0 %v3862_v9  ;;  %2186 = vmatprep.subr.bf16.mxu1 %v3864_v10 }
 0x419   :  { %v1490_v44 = vpop.f32.mrb[4].mxu0  ;;  %v1531_v45 = vpop.f32.mrb[16].mxu1 }
 0x41a   :  { %v1491_v46 = vadd.f32 %v1490_v44, %v1247_v38  ;;  %v1532_v47 = vadd.f32 %v1531_v45, %v1255_v39  ;;  %v1492_v48 = vpop.f32.mrb[5].mxu0  ;;  %v1533_v49 = vpop.f32.mrb[17].mxu1 }
 0x41b   :  { %v1493_v50 = vadd.f32 %v1492_v48, %v1251_v40  ;;  %v1534_v51 = vadd.f32 %v1533_v49, %v1259_v43  ;;  %v1494_v53 = vpop.f32.mrb[6].mxu0  ;;  %v1535_v54 = vpop.f32.mrb[18].mxu1 }
 0x41c   :  { %v1495_v55 = vpop.f32.mrb[7].mxu0  ;;  %v1536_v56 = vpop.f32.mrb[19].mxu1 }
 0x41d   :  { %v1542_v57 = vcombine.low %v1491_v46, %v1493_v50  ;;  %v1543_v58 = vcombine.high %v1491_v46, %v1493_v50  ;;  %v1544_v59 = vcombine.low %v1532_v47, %v1534_v51  ;;  %v1545_v60 = vcombine.high %v1532_v47, %v1534_v51 }
 0x41f   :  { %1550 = vst [vmem:[#allocation3] sm:$0xff] %v1542_v57  ;;  %1552 = vst [vmem:[#allocation3 + $0x10] sm:$0xff] %v1543_v58 }
 0x420   :  { %1551 = vst [vmem:[#allocation3 + $0x8] sm:$0xff] %v1544_v59  ;;  %1553 = vst [vmem:[#allocation3 + $0x18] sm:$0xff] %v1545_v60 }
 0x427   :  { %v1586_v50 = vld [vmem:[#allocation3] ss:$4 sm:$0xf]  ;;  %v1588_v51 = vld [vmem:[#allocation3 + $0x10] ss:$4 sm:$0xf] }
 0x439   :  { %v1783_v2 = vpop.f32.mrb[8].mxu0  ;;  %v1824_v34 = vpop.f32.mrb[20].mxu1 }
 0x43a   :  { %v1785_v35 = vpop.f32.mrb[9].mxu0  ;;  %v1826_v36 = vpop.f32.mrb[21].mxu1 }
 0x43b   :  { %v1835_v37 = vcombine.low %v1783_v2, %v1785_v35  ;;  %v1836_v38 = vcombine.low %v1824_v34, %v1826_v36  ;;  %v1787_v39 = vpop.f32.mrb[10].mxu0  ;;  %v1828_v40 = vpop.f32.mrb[22].mxu1 }
 0x43c   :  { %v1788_v43 = vpop.f32.mrb[11].mxu0  ;;  %v1829_v44 = vpop.f32.mrb[23].mxu1 }
 0x43d   :  { %v1843_v45 = vrot.slane %v1835_v37, %v4017_v63  ;;  %v1850_v46 = vrot.slane %v1836_v38, %v4017_v63 }
 0x43f   :  { %v1851_v47 = vcombine.low %v1843_v45, %v1850_v46  ;;  %v1852_v48 = vcombine.high %v1843_v45, %v1850_v46 }
 0x441   :  { %v1859_v49 = vrot.slane %v1851_v47, %v4017_v63  ;;  %v1866_v42 = vrot.slane %v1852_v48, %v4017_v63 }
 0x443   :  { %v1869_v53 = vadd.f32 %v1859_v49, %v1586_v50  ;;  %v1870_v54 = vadd.f32 %v1866_v42, %v1588_v51 }
 0x445   :  { %v2803_v55 = vmul.f32 -1.442695, %v1869_v53  ;;  %v2804_v56 = vmul.f32 -1.442695, %v1870_v54  ;;  %v1885_v57 = vrot.slane %v1869_v53, 1  ;;  %v1886_v58 = vrot.slane %v1870_v54, 1 }
 0x446   :  { %v1907_v15 = vrot.slane %v1869_v53, 3  ;;  %v1908_v61 = vrot.slane %v1870_v54, 3  ;;  %v1901_v62 = vrot.slane %v1869_v53, 2  ;;  %v1902_v2 = vrot.slane %v1870_v54, 2 }
 0x447   :  { %3120 = vpow2.f32 %v2803_v55  ;;  %v2805_v59 = vmul.f32 -1.442695, %v1885_v57  ;;  %v2806_v60 = vmul.f32 -1.442695, %v1886_v58 }
 0x448   :  { %3122 = vpow2.f32 %v2804_v56  ;;  %v2807_v34 = vmul.f32 -1.442695, %v1907_v15  ;;  %v2808_v35 = vmul.f32 -1.442695, %v1908_v61 }
 0x449   :  { %3124 = vpow2.f32 %v2805_v59 }
 0x44a   :  { %3126 = vpow2.f32 %v2806_v60 }
 0x44b   :  { %3128 = vtanh.f32 %v1901_v62 }
 0x44c   :  { %3130 = vtanh.f32 %v1902_v2 }
 0x44d   :  { %3132 = vpow2.f32 %v2807_v34 }
 0x44e   :  { %3134 = vpow2.f32 %v2808_v35 }
 0x451   :  { %v3121_v36 = vpop.eup %3120 }
 0x452   :  { %v3123_v37 = vpop.eup %3122  ;;  %v1877_v38 = vadd.f32 1.0, %v3121_v36 }
 0x453   :  { %v3125_v39 = vpop.eup %3124  ;;  %v1878_v40 = vadd.f32 1.0, %v3123_v37 }
 0x454   :  { %v3127_v43 = vpop.eup %3126  ;;  %3136 = vrcp.f32 %v1877_v38  ;;  %v1895_v44 = vadd.f32 1.0, %v3125_v39 }
 0x455   :  { %3138 = vrcp.f32 %v1878_v40  ;;  %v1896_v45 = vadd.f32 1.0, %v3127_v43  ;;  %v3129_v46 = vpop.eup %3128 }
 0x456   :  { %3140 = vrcp.f32 %v1895_v44  ;;  %v3131_v47 = vpop.eup %3130 }
 0x457   :  { %3142 = vrcp.f32 %v1896_v45  ;;  %v3133_v48 = vpop.eup %3132 }
 0x458   :  { %v3135_v49 = vpop.eup %3134  ;;  %v1917_v51 = vadd.f32 1.0, %v3133_v48 }
 0x459   :  { %v1918_v54 = vadd.f32 1.0, %v3135_v49 }
 0x45a   :  { %3144 = vrcp.f32 %v1917_v51 }
 0x45b   :  { %3146 = vrcp.f32 %v1918_v54 }
 0x45e   :  { %v3137_v42 = vpop.eup %3136 }
 0x45f   :  { %v3139_v50 = vpop.eup %3138  ;;  %v1925_v57 = vmul.f32 %v3137_v42, %v3129_v46 }
 0x460   :  { %v3141_v53 = vpop.eup %3140  ;;  %v1926_v59 = vmul.f32 %v3139_v50, %v3131_v47 }
 0x461   :  { %v3143_v55 = vpop.eup %3142  ;;  %v1923_v56 = vmul.f32 0.0, %v3141_v53 }
 0x462   :  { %v1924_v58 = vmul.f32 0.0, %v3143_v55 }
 0x463   :  { %v4023_v60 = vadd.f32 %v1925_v57, %v1923_v56 }
 0x464   :  { %v4025_v15 = vadd.f32 %v1926_v59, %v1924_v58  ;;  %v3145_v61 = vpop.eup %3144 }
 0x465   :  { %3148 = vtanh.f32 %v4023_v60  ;;  %v3147_v62 = vpop.eup %3146 }
 0x466   :  { %3150 = vtanh.f32 %v4025_v15 }
 0x46f   :  { %v3149_v2 = vpop.eup %3148 }
 0x470   :  { %v3151_v34 = vpop.eup %3150  ;;  %v1931_v35 = vmul.f32 %v3149_v2, %v3145_v61  ;;  %v1936_v61 = vld [vmem:[#allocation3 + $0x1] ss:$4 sm:$0xf] }
 0x471   :  { %v1932_v36 = vmul.f32 %v3151_v34, %v3147_v62  ;;  %v1938_v62 = vld [vmem:[#allocation3 + $0x11] ss:$4 sm:$0xf] }
 0x472   :  { %v1933_v37 = vpack.c.bf16 %v1931_v35, %v1931_v35 }
 0x473   :  { %v1934_v38 = vpack.c.bf16 %v1932_v36, %v1932_v36 }
 0x474   :  { %v1941_v40 = vunpack.c.l.b16 %v1933_v37 }
 0x475   :  { %v1942_v39 = vunpack.c.l.b16 %v1934_v38 }
 0x477   :  { %v1943_v43 = vrot.slane %v1942_v39, 7 }
 0x479   :  { %v1944_v44 = vsel %vm807_vm4, %v1943_v43, %v1941_v40 }
 0x47a   :  { %v1945_v45 = vpack.c.b16 %v1944_v44, %v1944_v44 }
 0x47c   :  { %1980 = vmatmul.mubr.bf16.vlgmr.msra.gmra.mrb[12].mxu0 %v1945_v45  ;;  %2021 = vmatmul.mubr.bf16.vlgmr.msra.gmra.mrb[24].mxu1 %v1945_v45 }
 0x47d   :  { %2146 = vmatpush1.bf16.msra.mxu0 %v3879_v0  ;;  %2187 = vmatpush1.bf16.msra.mxu1 %v3881_v1 }
 0x47e   :  { %2147 = vmatprep.subr.bf16.mxu0 %v3883_v3  ;;  %2188 = vmatprep.subr.bf16.mxu1 %v3885_v4 }
 0x47f   :  { %2177 = vmatprep.mubr.bf16.mxu0 %v3473_v6  ;;  %2218 = vmatprep.mubr.bf16.mxu1 %v3473_v6 }
 0x481   :  { %2148 = vmatpush1.bf16.msra.mxu0 %v3889_v5  ;;  %2189 = vmatpush1.bf16.msra.mxu1 %v3891_v7 }
 0x482   :  { %2149 = vmatprep.subr.bf16.mxu0 %v3895_v8  ;;  %2190 = vmatprep.subr.bf16.mxu1 %v3897_v11 }
 0x485   :  { %2150 = vmatpush1.bf16.msra.mxu0 %v3903_v12  ;;  %2191 = vmatpush1.bf16.msra.mxu1 %v3905_v13 }
 0x486   :  { %2151 = vmatprep.subr.bf16.mxu0 %v3909_v14  ;;  %2192 = vmatprep.subr.bf16.mxu1 %v3911_v16 }
 0x489   :  { %2152 = vmatpush1.bf16.msra.mxu0 %v3915_v17  ;;  %2193 = vmatpush1.bf16.msra.mxu1 %v3917_v18 }
 0x48a   :  { %2153 = vmatprep.subr.bf16.mxu0 %v3921_v19  ;;  %2194 = vmatprep.subr.bf16.mxu1 %v3923_v20 }
 0x48d   :  { %2154 = vmatpush1.bf16.msra.mxu0 %v3927_v21  ;;  %2195 = vmatpush1.bf16.msra.mxu1 %v3929_v22 }
 0x48e   :  { %2155 = vmatprep.subr.bf16.mxu0 %v3933_v23  ;;  %2196 = vmatprep.subr.bf16.mxu1 %v3935_v24 }
 0x491   :  { %2156 = vmatpush1.bf16.msra.mxu0 %v3939_v25  ;;  %2197 = vmatpush1.bf16.msra.mxu1 %v3941_v26 }
 0x492   :  { %2157 = vmatprep.subr.bf16.mxu0 %v3945_v27  ;;  %2198 = vmatprep.subr.bf16.mxu1 %v3947_v28 }
 0x495   :  { %2158 = vmatpush1.bf16.msra.mxu0 %v3951_v29  ;;  %2199 = vmatpush1.bf16.msra.mxu1 %v3953_v30 }
 0x496   :  { %2159 = vmatprep.subr.bf16.mxu0 %v3957_v31  ;;  %2200 = vmatprep.subr.bf16.mxu1 %v3959_v52 }
 0x499   :  { %2160 = vmatpush1.bf16.msra.mxu0 %v3963_v32  ;;  %2201 = vmatpush1.bf16.msra.mxu1 %v3965_v33 }
 0x49a   :  { %2343 = vmatprep.subr.bf16.mxu0 %v3862_v9  ;;  %2384 = vmatprep.subr.bf16.mxu1 %v3864_v10 }
 0x54f   :  { %v1981_v46 = vpop.f32.mrb[12].mxu0  ;;  %v2022_v47 = vpop.f32.mrb[24].mxu1 }
 0x550   :  { %v1983_v48 = vpop.f32.mrb[13].mxu0  ;;  %v2024_v49 = vpop.f32.mrb[25].mxu1 }
 0x551   :  { %v2033_v42 = vcombine.low %v1981_v46, %v1983_v48  ;;  %v2034_v50 = vcombine.low %v2022_v47, %v2024_v49  ;;  %v1985_v51 = vpop.f32.mrb[14].mxu0  ;;  %v2026_v53 = vpop.f32.mrb[26].mxu1 }
 0x552   :  { %v1986_v54 = vpop.f32.mrb[15].mxu0  ;;  %v2027_v55 = vpop.f32.mrb[27].mxu1 }
 0x553   :  { %v2041_v56 = vrot.slane %v2033_v42, %v4017_v63  ;;  %v2048_v57 = vrot.slane %v2034_v50, %v4017_v63 }
 0x555   :  { %v2049_v58 = vcombine.low %v2041_v56, %v2048_v57  ;;  %v2050_v59 = vcombine.high %v2041_v56, %v2048_v57 }
 0x557   :  { %v2057_v9 = vrot.slane %v2049_v58, %v4017_v63  ;;  %v2064_v10 = vrot.slane %v2050_v59, %v4017_v63 }
 0x559   :  { %v2067_v2 = vadd.f32 %v2057_v9, %v1936_v61  ;;  %v2068_v34 = vadd.f32 %v2064_v10, %v1938_v62 }
 0x55b   :  { %v2809_v35 = vmul.f32 -1.442695, %v2067_v2  ;;  %v2810_v36 = vmul.f32 -1.442695, %v2068_v34  ;;  %v2083_v37 = vrot.slane %v2067_v2, 1  ;;  %v2084_v38 = vrot.slane %v2068_v34, 1 }
 0x55c   :  { %v2105_v43 = vrot.slane %v2067_v2, 3  ;;  %v2106_v44 = vrot.slane %v2068_v34, 3  ;;  %v2099_v45 = vrot.slane %v2067_v2, 2  ;;  %v2100_v46 = vrot.slane %v2068_v34, 2 }
 0x55d   :  { %3152 = vpow2.f32 %v2809_v35  ;;  %v2811_v39 = vmul.f32 -1.442695, %v2083_v37  ;;  %v2812_v40 = vmul.f32 -1.442695, %v2084_v38 }
 0x55e   :  { %3154 = vpow2.f32 %v2810_v36  ;;  %v2813_v47 = vmul.f32 -1.442695, %v2105_v43  ;;  %v2814_v48 = vmul.f32 -1.442695, %v2106_v44 }
 0x55f   :  { %3156 = vpow2.f32 %v2811_v39 }
 0x560   :  { %3158 = vpow2.f32 %v2812_v40 }
 0x561   :  { %3160 = vtanh.f32 %v2099_v45 }
 0x562   :  { %3162 = vtanh.f32 %v2100_v46 }
 0x563   :  { %3164 = vpow2.f32 %v2813_v47 }
 0x564   :  { %3166 = vpow2.f32 %v2814_v48 }
 0x567   :  { %v3153_v49 = vpop.eup %3152 }
 0x568   :  { %v3155_v42 = vpop.eup %3154  ;;  %v2075_v50 = vadd.f32 1.0, %v3153_v49 }
 0x569   :  { %v3157_v51 = vpop.eup %3156  ;;  %v2076_v53 = vadd.f32 1.0, %v3155_v42 }
 0x56a   :  { %v3159_v54 = vpop.eup %3158  ;;  %3168 = vrcp.f32 %v2075_v50  ;;  %v2093_v55 = vadd.f32 1.0, %v3157_v51 }
 0x56b   :  { %3170 = vrcp.f32 %v2076_v53  ;;  %v2094_v56 = vadd.f32 1.0, %v3159_v54  ;;  %v3161_v57 = vpop.eup %3160 }
 0x56c   :  { %3172 = vrcp.f32 %v2093_v55  ;;  %v3163_v58 = vpop.eup %3162 }
 0x56d   :  { %3174 = vrcp.f32 %v2094_v56  ;;  %v3165_v59 = vpop.eup %3164 }
 0x56e   :  { %v3167_v9 = vpop.eup %3166  ;;  %v2115_v62 = vadd.f32 1.0, %v3165_v59 }
 0x56f   :  { %v2116_v34 = vadd.f32 1.0, %v3167_v9 }
 0x570   :  { %3176 = vrcp.f32 %v2115_v62 }
 0x571   :  { %3178 = vrcp.f32 %v2116_v34 }
 0x574   :  { %v3169_v10 = vpop.eup %3168 }
 0x575   :  { %v3171_v61 = vpop.eup %3170  ;;  %v2123_v36 = vmul.f32 %v3169_v10, %v3161_v57 }
 0x576   :  { %v3173_v2 = vpop.eup %3172  ;;  %v2124_v38 = vmul.f32 %v3171_v61, %v3163_v58 }
 0x577   :  { %v3175_v35 = vpop.eup %3174  ;;  %v2121_v37 = vmul.f32 %v3173_v2, %v4023_v60 }
 0x578   :  { %v2122_v39 = vmul.f32 %v3175_v35, %v4025_v15 }
 0x579   :  { %v4070_v40 = vadd.f32 %v2123_v36, %v2121_v37 }
 0x57a   :  { %v4072_v43 = vadd.f32 %v2124_v38, %v2122_v39  ;;  %v3177_v44 = vpop.eup %3176 }
 0x57b   :  { %3180 = vtanh.f32 %v4070_v40  ;;  %v3179_v45 = vpop.eup %3178 }
 0x57c   :  { %3182 = vtanh.f32 %v4072_v43 }
 0x585   :  { %v3181_v46 = vpop.eup %3180 }
 0x586   :  { %v3183_v47 = vpop.eup %3182  ;;  %v2129_v48 = vmul.f32 %v3181_v46, %v3177_v44 }
 0x587   :  { %v2130_v49 = vmul.f32 %v3183_v47, %v3179_v45 }
 0x588   :  { %v2131_v60 = vpack.c.bf16 %v2129_v48, %v2129_v48 }
 0x589   :  { %v2132_v42 = vpack.c.bf16 %v2130_v49, %v2130_v49 }
 0x58a   :  { %v2139_v15 = vunpack.c.l.b16 %v2131_v60 }
 0x58b   :  { %v2140_v50 = vunpack.c.l.b16 %v2132_v42 }
 0x58d   :  { %v2141_v51 = vrot.slane %v2140_v50, 7 }
 0x58f   :  { %v2142_v53 = vsel %vm807_vm4, %v2141_v51, %v2139_v15 }
 0x590   :  { %v2143_v54 = vpack.c.b16 %v2142_v53, %v2142_v53 }
 0x592   :  { %2178 = vmatmul.mubr.bf16.vlgmr.msra.gmra.mrb[16].mxu0 %v2143_v54  ;;  %2219 = vmatmul.mubr.bf16.vlgmr.msra.gmra.mrb[28].mxu1 %v2143_v54 }
 0x593   :  { %2344 = vmatpush1.bf16.msra.mxu0 %v3879_v0  ;;  %2385 = vmatpush1.bf16.msra.mxu1 %v3881_v1 }
 0x594   :  { %2345 = vmatprep.subr.bf16.mxu0 %v3883_v3  ;;  %2386 = vmatprep.subr.bf16.mxu1 %v3885_v4 }
 0x595   :  { %2375 = vmatprep.mubr.bf16.mxu0 %v3473_v6  ;;  %2416 = vmatprep.mubr.bf16.mxu1 %v3473_v6 }
 0x597   :  { %2346 = vmatpush1.bf16.msra.mxu0 %v3889_v5  ;;  %2387 = vmatpush1.bf16.msra.mxu1 %v3891_v7 }
 0x598   :  { %2347 = vmatprep.subr.bf16.mxu0 %v3895_v8  ;;  %2388 = vmatprep.subr.bf16.mxu1 %v3897_v11 }
 0x59b   :  { %2348 = vmatpush1.bf16.msra.mxu0 %v3903_v12  ;;  %2389 = vmatpush1.bf16.msra.mxu1 %v3905_v13 }
 0x59c   :  { %2349 = vmatprep.subr.bf16.mxu0 %v3909_v14  ;;  %2390 = vmatprep.subr.bf16.mxu1 %v3911_v16 }
 0x59f   :  { %2350 = vmatpush1.bf16.msra.mxu0 %v3915_v17  ;;  %2391 = vmatpush1.bf16.msra.mxu1 %v3917_v18 }
 0x5a0   :  { %2351 = vmatprep.subr.bf16.mxu0 %v3921_v19  ;;  %2392 = vmatprep.subr.bf16.mxu1 %v3923_v20  ;;  %v2134_v20 = vld [vmem:[#allocation3 + $0x2] ss:$4 sm:$0xf] }
 0x5a3   :  { %2352 = vmatpush1.bf16.msra.mxu0 %v3927_v21  ;;  %2393 = vmatpush1.bf16.msra.mxu1 %v3929_v22  ;;  %v2136_v21 = vld [vmem:[#allocation3 + $0x12] ss:$4 sm:$0xf] }
 0x5a4   :  { %2353 = vmatprep.subr.bf16.mxu0 %v3933_v23  ;;  %2394 = vmatprep.subr.bf16.mxu1 %v3935_v24 }
 0x5a7   :  { %2354 = vmatpush1.bf16.msra.mxu0 %v3939_v25  ;;  %2395 = vmatpush1.bf16.msra.mxu1 %v3941_v26 }
 0x5a8   :  { %2355 = vmatprep.subr.bf16.mxu0 %v3945_v27  ;;  %2396 = vmatprep.subr.bf16.mxu1 %v3947_v28 }
 0x5ab   :  { %2356 = vmatpush1.bf16.msra.mxu0 %v3951_v29  ;;  %2397 = vmatpush1.bf16.msra.mxu1 %v3953_v30 }
 0x5ac   :  { %2357 = vmatprep.subr.bf16.mxu0 %v3957_v31  ;;  %2398 = vmatprep.subr.bf16.mxu1 %v3959_v52 }
 0x5af   :  { %2358 = vmatpush1.bf16.msra.mxu0 %v3963_v32  ;;  %2399 = vmatpush1.bf16.msra.mxu1 %v3965_v33 }
 0x5b0   :  { %2941 = vmatprep.subr.bf16.mxu0 %v3470_v41 }
 0x665   :  { %v2179_v6 = vpop.f32.mrb[16].mxu0  ;;  %v2220_v0 = vpop.f32.mrb[28].mxu1 }
 0x666   :  { %v2181_v1 = vpop.f32.mrb[17].mxu0  ;;  %v2222_v3 = vpop.f32.mrb[29].mxu1 }
 0x667   :  { %v2231_v4 = vcombine.low %v2179_v6, %v2181_v1  ;;  %v2232_v5 = vcombine.low %v2220_v0, %v2222_v3  ;;  %v2183_v7 = vpop.f32.mrb[18].mxu0  ;;  %v2224_v8 = vpop.f32.mrb[30].mxu1 }
 0x668   :  { %v2184_v11 = vpop.f32.mrb[19].mxu0  ;;  %v2225_v12 = vpop.f32.mrb[31].mxu1  ;;  %v3108_v8 = vld [vmem:[%s4187_s12] sm:$0xff]  }
 0x669   :  { %v2239_v13 = vrot.slane %v2231_v4, %v4017_v63  ;;  %v2246_v14 = vrot.slane %v2232_v5, %v4017_v63  ;;  %v3109_v11 = vld [vmem:[%s4187_s12 + $0x8] sm:$0xff]   ;;  %v3110_v12 = vld [vmem:[%s4187_s12 + $0x10] sm:$0xff]  }
 0x66b   :  { %v2247_v16 = vcombine.low %v2239_v13, %v2246_v14  ;;  %v2248_v17 = vcombine.high %v2239_v13, %v2246_v14  ;;  %v3111_v13 = vld [vmem:[%s4187_s12 + $0x18] sm:$0xff]   ;;  %v3112_v14 = vld [vmem:[%s4187_s12 + $0x20] sm:$0xff]  }
 0x66d   :  { %v2255_v18 = vrot.slane %v2247_v16, %v4017_v63  ;;  %v2262_v19 = vrot.slane %v2248_v17, %v4017_v63  ;;  %v3113_v16 = vld [vmem:[%s4187_s12 + $0x28] sm:$0xff]   ;;  %v3114_v17 = vld [vmem:[%s4187_s12 + $0x30] sm:$0xff]  }
 0x66f   :  { %v2265_v22 = vadd.f32 %v2255_v18, %v2134_v20  ;;  %v2266_v23 = vadd.f32 %v2262_v19, %v2136_v21  ;;  %v3115_v18 = vld [vmem:[%s4187_s12 + $0x38] sm:$0xff]   ;;  %s3475_s12 = smov [#allocation18]  }
 0x670   :  { %s2655_s24 = sshll.u32 %s3475_s12, 4  ;;  %s2656_s24 = int_to_ptr.vmem [resolvable:$true] %s2655_s24 }
 0x671   :  { %v2815_v24 = vmul.f32 -1.442695, %v2265_v22  ;;  %v2816_v25 = vmul.f32 -1.442695, %v2266_v23  ;;  %v2281_v26 = vrot.slane %v2265_v22, 1  ;;  %v2282_v27 = vrot.slane %v2266_v23, 1  ;;  %p3429_p9 = scmp.lt.s32.totalorder %s2656_s24, %s2656_s24 }
 0x672   :  { %v2303_v30 = vrot.slane %v2265_v22, 3  ;;  %v2304_v31 = vrot.slane %v2266_v23, 3  ;;  %v2297_v52 = vrot.slane %v2265_v22, 2  ;;  %v2298_v32 = vrot.slane %v2266_v23, 2  ;;  %s3424_s15 = scalar_lea.vmem %s2656_s24, 32 }
 0x673   :  { %3184 = vpow2.f32 %v2815_v24  ;;  %v2817_v28 = vmul.f32 -1.442695, %v2281_v26  ;;  %v2818_v29 = vmul.f32 -1.442695, %v2282_v27  ;;  %p3425_p8 = scmp.ne.s32.totalorder %s2656_s24, %s3424_s15  ;;  %p3430_p10 = scmp.lt.s32.totalorder %s3424_s15, %s3424_s15 }
 0x674   :  { %3186 = vpow2.f32 %v2816_v25  ;;  %v2819_v33 = vmul.f32 -1.442695, %v2303_v30  ;;  %v2820_v55 = vmul.f32 -1.442695, %v2304_v31 }
 0x675   :  { %3188 = vpow2.f32 %v2817_v28  ;;  %p3431_p11 = por %p3430_p10, %p3429_p9 }
 0x676   :  { %3190 = vpow2.f32 %v2818_v29 }
 0x677   :  { %3192 = vtanh.f32 %v2297_v52  ;;  %p3432_p12 = pnand %p3431_p11, %p3425_p8 }
 0x678   :  { %3194 = vtanh.f32 %v2298_v32 }
 0x679   :  { %3196 = vpow2.f32 %v2819_v33  ;;  %v2332_v33 = vld [vmem:[#allocation3 + $0x3] ss:$4 sm:$0xf] }
 0x67a   :  { %3198 = vpow2.f32 %v2820_v55  ;;  %v2334_v55 = vld [vmem:[#allocation3 + $0x13] ss:$4 sm:$0xf] }
 0x67d   :  { %v3185_v56 = vpop.eup %3184 }
 0x67e   :  { %v3187_v57 = vpop.eup %3186  ;;  %v2273_v58 = vadd.f32 1.0, %v3185_v56 }
 0x67f   :  { %v3189_v59 = vpop.eup %3188  ;;  %v2274_v9 = vadd.f32 1.0, %v3187_v57 }
 0x680   :  { %v3191_v10 = vpop.eup %3190  ;;  %3200 = vrcp.f32 %v2273_v58  ;;  %v2291_v61 = vadd.f32 1.0, %v3189_v59 }
 0x681   :  { %3202 = vrcp.f32 %v2274_v9  ;;  %v2292_v62 = vadd.f32 1.0, %v3191_v10  ;;  %v3193_v2 = vpop.eup %3192 }
 0x682   :  { %3204 = vrcp.f32 %v2291_v61  ;;  %v3195_v34 = vpop.eup %3194 }
 0x683   :  { %3206 = vrcp.f32 %v2292_v62  ;;  %v3197_v35 = vpop.eup %3196 }
 0x684   :  { %v3199_v36 = vpop.eup %3198  ;;  %v2313_v39 = vadd.f32 1.0, %v3197_v35 }
 0x685   :  { %v2314_v45 = vadd.f32 1.0, %v3199_v36 }
 0x686   :  { %3208 = vrcp.f32 %v2313_v39 }
 0x687   :  { %3210 = vrcp.f32 %v2314_v45 }
 0x68a   :  { %v3201_v37 = vpop.eup %3200 }
 0x68b   :  { %v3203_v38 = vpop.eup %3202  ;;  %v2321_v47 = vmul.f32 %v3201_v37, %v3193_v2 }
 0x68c   :  { %v3205_v44 = vpop.eup %3204  ;;  %v2322_v49 = vmul.f32 %v3203_v38, %v3195_v34 }
 0x68d   :  { %v3207_v46 = vpop.eup %3206  ;;  %v2319_v48 = vmul.f32 %v3205_v44, %v4070_v40 }
 0x68e   :  { %v2320_v60 = vmul.f32 %v3207_v46, %v4072_v43 }
 0x68f   :  { %v4116_v42 = vadd.f32 %v2321_v47, %v2319_v48 }
 0x690   :  { %v4118_v50 = vadd.f32 %v2322_v49, %v2320_v60  ;;  %v3209_v15 = vpop.eup %3208 }
 0x691   :  { %3212 = vtanh.f32 %v4116_v42  ;;  %v3211_v51 = vpop.eup %3210 }
 0x692   :  { %3214 = vtanh.f32 %v4118_v50 }
 0x69b   :  { %v3213_v53 = vpop.eup %3212 }
 0x69c   :  { %v3215_v54 = vpop.eup %3214  ;;  %v2327_v6 = vmul.f32 %v3213_v53, %v3209_v15 }
 0x69d   :  { %v2328_v0 = vmul.f32 %v3215_v54, %v3211_v51 }
 0x69e   :  { %v2329_v40 = vpack.c.bf16 %v2327_v6, %v2327_v6 }
 0x69f   :  { %v2330_v1 = vpack.c.bf16 %v2328_v0, %v2328_v0 }
 0x6a0   :  { %v2337_v43 = vunpack.c.l.b16 %v2329_v40 }
 0x6a1   :  { %v2338_v3 = vunpack.c.l.b16 %v2330_v1 }
 0x6a3   :  { %v2339_v4 = vrot.slane %v2338_v3, 7 }
 0x6a5   :  { %v2340_v5 = vsel %vm807_vm4, %v2339_v4, %v2337_v43 }
 0x6a6   :  { %v2341_v7 = vpack.c.b16 %v2340_v5, %v2340_v5 }
 0x6a8   :  { %2376 = vmatmul.mubr.bf16.vlgmr.msra.gmra.mrb[20].mxu0 %v2341_v7  ;;  %2417 = vmatmul.mubr.bf16.vlgmr.msra.gmra.mrb[32].mxu1 %v2341_v7 }
 0x6a9   :  { %2957 = vmatprep.mubr.msk.bf16.mxu0 %vm3471_vm3, %v3470_v41  ;;  %2942 = vmatpush3.bf16.msra.mxu0 %v3108_v8 }
 0x6aa   :  { %2943 = vmatprep.subr.bf16.mxu0 %v3470_v41 }
 0x6ad   :  { %2944 = vmatpush3.bf16.msra.mxu0 %v3109_v11 }
 0x6ae   :  { %2945 = vmatprep.subr.bf16.mxu0 %v3470_v41 }
 0x6b1   :  { %2946 = vmatpush3.bf16.msra.mxu0 %v3110_v12 }
 0x6b2   :  { %2947 = vmatprep.subr.bf16.mxu0 %v3470_v41 }
 0x6b5   :  { %2948 = vmatpush3.bf16.msra.mxu0 %v3111_v13 }
 0x6b6   :  { %2949 = vmatprep.subr.bf16.mxu0 %v3470_v41 }
 0x6b9   :  { %2950 = vmatpush3.bf16.msra.mxu0 %v3112_v14 }
 0x6ba   :  { %2951 = vmatprep.subr.bf16.mxu0 %v3470_v41 }
 0x6bd   :  { %2952 = vmatpush3.bf16.msra.mxu0 %v3113_v16 }
 0x6be   :  { %2953 = vmatprep.subr.bf16.mxu0 %v3470_v41 }
 0x6c1   :  { %2954 = vmatpush3.bf16.msra.mxu0 %v3114_v17 }
 0x6c2   :  { %2955 = vmatprep.subr.bf16.mxu0 %v3470_v41 }
 0x6c5   :  { %2956 = vmatpush3.bf16.msra.mxu0 %v3115_v18 }
 0x77b   :  { %v2377_v19 = vpop.f32.mrb[20].mxu0  ;;  %v2418_v20 = vpop.f32.mrb[32].mxu1 }
 0x77c   :  { %v2379_v21 = vpop.f32.mrb[21].mxu0  ;;  %v2420_v22 = vpop.f32.mrb[33].mxu1 }
 0x77d   :  { %v2429_v23 = vcombine.low %v2377_v19, %v2379_v21  ;;  %v2430_v24 = vcombine.low %v2418_v20, %v2420_v22  ;;  %v2381_v25 = vpop.f32.mrb[22].mxu0  ;;  %v2422_v26 = vpop.f32.mrb[34].mxu1 }
 0x77e   :  { %v2382_v27 = vpop.f32.mrb[23].mxu0  ;;  %v2423_v28 = vpop.f32.mrb[35].mxu1 }
 0x77f   :  { %v2437_v29 = vrot.slane %v2429_v23, %v4017_v63  ;;  %v2444_v30 = vrot.slane %v2430_v24, %v4017_v63  ;;  %v2827_v24 = vld [vmem:[#allocation16] ss:$0 sm:$0xff] }
 0x781   :  { %v2445_v31 = vcombine.low %v2437_v29, %v2444_v30  ;;  %v2446_v52 = vcombine.high %v2437_v29, %v2444_v30 }
 0x783   :  { %v2453_v32 = vrot.slane %v2445_v31, %v4017_v63  ;;  %v2460_v41 = vrot.slane %v2446_v52, %v4017_v63 }
 0x785   :  { %v2463_v56 = vadd.f32 %v2453_v32, %v2332_v33  ;;  %v2464_v57 = vadd.f32 %v2460_v41, %v2334_v55 }
 0x787   :  { %v2821_v58 = vmul.f32 -1.442695, %v2463_v56  ;;  %v2822_v59 = vmul.f32 -1.442695, %v2464_v57  ;;  %v2479_v9 = vrot.slane %v2463_v56, 1  ;;  %v2480_v10 = vrot.slane %v2464_v57, 1 }
 0x788   :  { %v2501_v2 = vrot.slane %v2463_v56, 3  ;;  %v2502_v34 = vrot.slane %v2464_v57, 3  ;;  %v2495_v35 = vrot.slane %v2463_v56, 2  ;;  %v2496_v36 = vrot.slane %v2464_v57, 2 }
 0x789   :  { %3216 = vpow2.f32 %v2821_v58  ;;  %v2823_v61 = vmul.f32 -1.442695, %v2479_v9  ;;  %v2824_v62 = vmul.f32 -1.442695, %v2480_v10 }
 0x78a   :  { %3218 = vpow2.f32 %v2822_v59  ;;  %v2825_v37 = vmul.f32 -1.442695, %v2501_v2  ;;  %v2826_v63 = vmul.f32 -1.442695, %v2502_v34 }
 0x78b   :  { %3220 = vpow2.f32 %v2823_v61 }
 0x78c   :  { %3222 = vpow2.f32 %v2824_v62 }
 0x78d   :  { %3224 = vtanh.f32 %v2495_v35 }
 0x78e   :  { %3226 = vtanh.f32 %v2496_v36 }
 0x78f   :  { %3228 = vpow2.f32 %v2825_v37 }
 0x790   :  { %3230 = vpow2.f32 %v2826_v63 }
 0x793   :  { %v3217_v38 = vpop.eup %3216 }
 0x794   :  { %v3219_v39 = vpop.eup %3218  ;;  %v2471_v44 = vadd.f32 1.0, %v3217_v38 }
 0x795   :  { %v3221_v45 = vpop.eup %3220  ;;  %v2472_v46 = vadd.f32 1.0, %v3219_v39 }
 0x796   :  { %v3223_v47 = vpop.eup %3222  ;;  %3232 = vrcp.f32 %v2471_v44  ;;  %v2489_v48 = vadd.f32 1.0, %v3221_v45 }
 0x797   :  { %3234 = vrcp.f32 %v2472_v46  ;;  %v2490_v49 = vadd.f32 1.0, %v3223_v47  ;;  %v3225_v60 = vpop.eup %3224 }
 0x798   :  { %3236 = vrcp.f32 %v2489_v48  ;;  %v3227_v15 = vpop.eup %3226 }
 0x799   :  { %3238 = vrcp.f32 %v2490_v49  ;;  %v3229_v51 = vpop.eup %3228 }
 0x79a   :  { %v3231_v53 = vpop.eup %3230  ;;  %v2511_v0 = vadd.f32 1.0, %v3229_v51 }
 0x79b   :  { %v2512_v1 = vadd.f32 1.0, %v3231_v53 }
 0x79c   :  { %3240 = vrcp.f32 %v2511_v0 }
 0x79d   :  { %3242 = vrcp.f32 %v2512_v1 }
 0x7a0   :  { %v3233_v54 = vpop.eup %3232 }
 0x7a1   :  { %v3235_v6 = vpop.eup %3234  ;;  %v2519_v4 = vmul.f32 %v3233_v54, %v3225_v60 }
 0x7a2   :  { %v3237_v40 = vpop.eup %3236  ;;  %v2520_v7 = vmul.f32 %v3235_v6, %v3227_v15 }
 0x7a3   :  { %v3239_v3 = vpop.eup %3238  ;;  %v2517_v43 = vmul.f32 %v3237_v40, %v4116_v42 }
 0x7a4   :  { %v2518_v5 = vmul.f32 %v3239_v3, %v4118_v50 }
 0x7a5   :  { %v2521_v8 = vadd.f32 %v2519_v4, %v2517_v43 }
 0x7a6   :  { %v2522_v11 = vadd.f32 %v2520_v7, %v2518_v5  ;;  %v3241_v12 = vpop.eup %3240 }
 0x7a7   :  { %3244 = vtanh.f32 %v2521_v8  ;;  %v3243_v13 = vpop.eup %3242 }
 0x7a8   :  { %3246 = vtanh.f32 %v2522_v11 }
 0x7b1   :  { %v3245_v14 = vpop.eup %3244 }
 0x7b2   :  { %v3247_v16 = vpop.eup %3246  ;;  %v2525_v17 = vmul.f32 %v3245_v14, %v3241_v12 }
 0x7b3   :  { %v2526_v18 = vmul.f32 %v3247_v16, %v3243_v13 }
 0x7b4   :  { %v2527_v19 = vpack.c.bf16 %v2525_v17, %v2525_v17 }
 0x7b5   :  { %v2528_v20 = vpack.c.bf16 %v2526_v18, %v2526_v18 }
 0x7b6   :  { %v2554_v42 = vunpack.c.l.b16 %v2527_v19 }
 0x7b7   :  { %v2555_v21 = vunpack.c.l.b16 %v2528_v20 }
 0x7b9   :  { %v2556_v22 = vrot.slane %v2555_v21, 7 }
 0x7bb   :  { %v2557_v50 = vsel %vm807_vm4, %v2556_v22, %v2554_v42 }
 0x7bc   :  { %v2558_v23 = vpack.c.b16 %v2557_v50, %v2557_v50 }
 0x7be   :  { %2958 = vmatmul.mubr.bf16.vlgmr.msra.gmra.mrb[24].mxu0 %v2558_v23 }
 0x891   :  { %v2642_v25 = vpop.f32.mrb[24].mxu0 }
 0x892   :  { %v2643_v26 = vadd.f32 %v2827_v24, %v2642_v25  ;;  %v2959_v27 = vpop.f32.mrb[25].mxu0 }
 0x893   :  { %v2645_v28 = vpop.f32.mrb[26].mxu0 }
 0x894   :  { %2648 = vst [vmem:[#allocation18] sm:$0x3] %v2643_v26  ;;  %v2960_v29 = vpop.f32.mrb[27].mxu0 }
 0x895   :  { %3435 = shalt.err (!%p3432_p12)
}
 0x896   :  { %s3436_s8 = scalar_lea.hbm %s4189_s14, 32 }
 0x897   :  { %p3437_p13 = scmp.ne.s32.totalorder %s4189_s14, %s3436_s8  ;;  %p3440_p0 = scmp.lt.u32.totalorder %s3436_s8, %s4189_s14 }
 0x899   :  { %p3442_p1 = pnand %p3440_p0, %p3437_p13 }
 0x89b   :  { %3445 = shalt.err (!%p3442_p1)
}
 0x89c   :  { %2658 = dma.vmem_to_hbm [thread:$0]  %s2656_s24, 32, %s4189_s14, [#allocation6]  }
 0x89d   :  { %3456 = dma.done.wait [#allocation6], 32  }
 0x89e   :  { %3457 = vsyncadd [#allocation6], 4294967264 }
 0x89f   :  { %2662 = vsyncpa [#allocation5], 1 }
 0x8a0   :  { %2663 = vsyncpa [#allocation8], 1 }
 0x8a1   :  { %2664 = vsyncpa [#allocation11], 1 }
 0x8a2   :  { %2665 = vsyncpa [#allocation14], 1 }
 0x8a3   :  { %2666 = vsyncpa [#allocation17], 1 }
 0x8a4   :  { %2667 = vsyncpa [#allocation6], 1 }

</bundles_post_ra>
